<compile_context>
chip_gen: v6e
topology: v6e:2x2x1
jax: 0.10.0
libtpu: 0.0.40
codegen_flags: <defaults>
</compile_context>

<pallas_src>
import functools

import jax
import jax.numpy as jnp
from jax import lax
from jax.experimental import pallas as pl
from jax.experimental.pallas import tpu as pltpu

TAU_MIN = 1.0
TAU_MAX = 100.0
LN_EPS = 1e-5  # PyTorch nn.LayerNorm default


def _round_up(a, b):
    return -(-a // b) * b


def ltc_kernel(
    x_ref, h_ref,                    # (tm, H) activation row tiles (any float dtype)
    gs_ref, bs_ref,                  # state_norm gamma / beta            (1, H) f32
    g1x_ref, b1x_ref,                # ltc_cell LayerNorm(2H), x-half     (1, H) f32
    g1h_ref, b1h_ref,                # ltc_cell LayerNorm(2H), h-half     (1, H) f32
    w1x_ref, w1h_ref, c1_ref,        # ltc_cell Linear(2H->H) split       (H, H) bf16, (1, H) f32
    w2_ref, c2_ref,                  # ltc_cell Linear(H->H)
    g2_ref, b2_ref,                  # tau_net LayerNorm(H)
    wt1_ref, ct1_ref,                # tau_net Linear(H->H)
    wt2_ref, ct2_ref,                # tau_net Linear(H->H)
    dt_ref,                          # (tm, 1) per-row dt
    out_ref,                         # (tm, H)
    *, hidden_dim,
):
    inv_h = 1.0 / float(hidden_dim)
    inv_2h = 0.5 * inv_h

    # Elementwise / LayerNorm math in f32 (v5e VPU/EUP have no bf16).
    x = x_ref[...].astype(jnp.float32)
    h = h_ref[...].astype(jnp.float32)
    gs = gs_ref[...]
    bs = bs_ref[...]

    def state_ln(v):
        # Two-pass (v - mu)^2 variance: robust to large raw-activation means
        # (review correctness note).  Garbage rows from the ragged last block can
        # only produce NaN/Inf in their own (discarded) output rows.
        mu = jnp.sum(v, axis=-1, keepdims=True) * inv_h
        d = v - mu
        var = jnp.sum(d * d, axis=-1, keepdims=True) * inv_h
        return d * lax.rsqrt(var + LN_EPS) * gs + bs

    xn = state_ln(x)
    hn = state_ln(h)

    # One reduction pass over xn / hn, reused for (a) the LayerNorm over the
    # *virtual* concatenation [xn, hn] of width 2H (no (tm, 2H) temp) and (b) the
    # tau_net LayerNorm on hn.  xn / hn are normalized, so E[v^2]-E[v]^2 is safe.
    s_xn = jnp.sum(xn, -1, keepdims=True)
    s_xn2 = jnp.sum(xn * xn, -1, keepdims=True)
    s_hn = jnp.sum(hn, -1, keepdims=True)
    s_hn2 = jnp.sum(hn * hn, -1, keepdims=True)

    mu_c = (s_xn + s_hn) * inv_2h
    ms_c = (s_xn2 + s_hn2) * inv_2h
    r_c = lax.rsqrt(ms_c - mu_c * mu_c + LN_EPS)
    xc = ((xn - mu_c) * r_c * g1x_ref[...] + b1x_ref[...]).astype(jnp.bfloat16)
    hc = ((hn - mu_c) * r_c * g1h_ref[...] + b1h_ref[...]).astype(jnp.bfloat16)

    # ltc_cell: Linear(2H->H) as two K=H bf16 matmuls (f32 accumulation) -> Tanh -> Linear.
    # TODO(synk): for H <= 128 on v6e/v7x, merge into one K=2H matmul (stacked w1)
    # once a bundle dump shows the MXU binding (irrelevant while HBM-bound).
    pre = (jnp.dot(xc, w1x_ref[...], preferred_element_type=jnp.float32)
           + jnp.dot(hc, w1h_ref[...], preferred_element_type=jnp.float32)
           + c1_ref[...])
    t = jnp.tanh(pre).astype(jnp.bfloat16)
    dh = jnp.dot(t, w2_ref[...], preferred_element_type=jnp.float32) + c2_ref[...]

    # tau_net on the state-normalized h: LN (reusing hn sums) -> Linear -> ReLU
    # -> Linear -> Sigmoid.
    mu_h = s_hn * inv_h
    var_h = s_hn2 * inv_h - mu_h * mu_h
    h_ln = ((hn - mu_h) * lax.rsqrt(var_h + LN_EPS) * g2_ref[...]
            + b2_ref[...]).astype(jnp.bfloat16)
    r1 = jnp.maximum(
        jnp.dot(h_ln, wt1_ref[...], preferred_element_type=jnp.float32) + ct1_ref[...],
        0.0,
    ).astype(jnp.bfloat16)
    logit = jnp.dot(r1, wt2_ref[...], preferred_element_type=jnp.float32) + ct2_ref[...]
    tau = TAU_MIN + (TAU_MAX - TAU_MIN) * jax.nn.sigmoid(logit)

    # h_new = hn + (dh - hn) * dt / tau; divide on the EUP approx-reciprocal slot
    # (~1e-3 relative error in alpha; inside tolerance, documented).
    alpha = dt_ref[...].astype(jnp.float32) * pl.reciprocal(tau, approx=True)
    out_ref[...] = (hn + (dh - hn) * alpha).astype(out_ref.dtype)


def init_params(key, hidden_dim):
    H = hidden_dim
    ks = jax.random.split(key, 4)

    def lin(k, fan_in, fan_out):
        # torch.nn.Linear default init: U(-1/sqrt(fan_in), 1/sqrt(fan_in))
        bound = 1.0 / jnp.sqrt(fan_in)
        kw, kb = jax.random.split(k)
        w = jax.random.uniform(kw, (fan_in, fan_out), jnp.float32, -bound, bound)
        b = jax.random.uniform(kb, (1, fan_out), jnp.float32, -bound, bound)
        return w, b

    w1, c1 = lin(ks[0], 2 * H, H)
    w2, c2 = lin(ks[1], H, H)
    wt1, ct1 = lin(ks[2], H, H)
    wt2, ct2 = lin(ks[3], H, H)
    return dict(
        gs=jnp.ones((1, H), jnp.float32), bs=jnp.zeros((1, H), jnp.float32),
        g1=jnp.ones((1, 2 * H), jnp.float32), b1=jnp.zeros((1, 2 * H), jnp.float32),
        w1=w1, c1=c1, w2=w2, c2=c2,
        g2=jnp.ones((1, H), jnp.float32), b2=jnp.zeros((1, H), jnp.float32),
        wt1=wt1, ct1=ct1, wt2=wt2, ct2=ct2,
    )


def _vmem_capacity_bytes():
    """Best-effort per-core VMEM capacity; conservative (v7x 64 MiB) fallback."""
    try:
        cap = int(pltpu.get_tpu_info().vmem_capacity_bytes)
        if cap > 0:
            return cap
    except Exception:
        pass
    try:
        kind = jax.devices()[0].device_kind.lower()
        if any(g in kind for g in ("v4", "v5", "v6")):
            return 128 * 1024 * 1024
    except Exception:
        pass
    return 64 * 1024 * 1024


def _pick_row_tile(M, H, in_bytes, out_bytes, vmem_budget):
    Hl = _round_up(max(H, 128), 128)          # lane-padded width as resident in VMEM
    # Resident weights: 5 HxH bf16 matrices + 12 (1,H) f32 vectors; budget them as
    # double-buffered in case the Buffered(1) request is not honored.
    weight_vmem = 2 * (5 * Hl * Hl * 2 + 12 * Hl * 4)
    # Per row: double-buffered x/h/out tiles + ~10 live f32 (tm, Hl) temporaries
    # (xn, hn, d, xc, hc, pre, t, dh, h_ln, r1, tau, ...) Mosaic materializes.
    per_row = 2 * (2 * in_bytes + out_bytes) * Hl + 10 * 4 * Hl
    budget = max(vmem_budget - weight_vmem - (4 << 20), 2 << 20)
    tm = 2048                                  # big tiles amortize ~0.35us/step overhead
    while tm > 64 and tm * per_row > budget:
        tm //= 2
    tm = min(tm, _round_up(M, 8))
    return max(8, (tm // 8) * 8)


def ltc_forward(x, h, dt, params, *, row_tile=None, out_dtype=None):
    B, T, H = x.shape
    M = B * T
    if h is None:
        h = jnp.zeros_like(x)
    out_dtype = x.dtype if out_dtype is None else out_dtype

    cap = _vmem_capacity_bytes()
    vmem_limit = min(cap * 7 // 8, 100 * 1024 * 1024)   # ~56 MiB on v7x, ~100 MiB v5e/v6e

    in_bytes = max(jnp.dtype(x.dtype).itemsize, jnp.dtype(h.dtype).itemsize)
    out_bytes = jnp.dtype(out_dtype).itemsize
    if row_tile is None:
        tm = _pick_row_tile(M, H, in_bytes, out_bytes, vmem_limit)
    else:
        tm = max(8, (int(row_tile) // 8) * 8)
    grid = (pl.cdiv(M, tm),)                   # ragged last block; OOB writes dropped

    # Contiguous leading-dim merges only -- no pad, no slice, no extra HBM pass.
    x2 = x.reshape(M, H)
    h2 = h.reshape(M, H)
    dt_arr = jnp.asarray(dt, jnp.float32)
    if dt_arr.ndim == 0:
        dt_arr = jnp.broadcast_to(dt_arr, (B,))
    dt_rows = jnp.broadcast_to(dt_arr.reshape(B, 1), (B, T)).reshape(M, 1)

    p = params

    def vec(a):                                # LN params / biases stay f32
        return a.astype(jnp.float32).reshape(1, H)

    def mat(a):                                # matmul weights in bf16 (halves VMEM)
        return a.astype(jnp.bfloat16)

    # Split w1 / g1 / b1 into the x-half and h-half (removes the in-kernel concat).
    g1x, g1h = p["g1"][:, :H], p["g1"][:, H:]
    b1x, b1h = p["b1"][:, :H], p["b1"][:, H:]
    w1x, w1h = p["w1"][:H, :], p["w1"][H:, :]

    weight_args = [
        vec(p["gs"]), vec(p["bs"]),
        vec(g1x), vec(b1x), vec(g1h), vec(b1h),
        mat(w1x), mat(w1h), vec(p["c1"]),
        mat(p["w2"]), vec(p["c2"]),
        vec(p["g2"]), vec(p["b2"]),
        mat(p["wt1"]), vec(p["ct1"]),
        mat(p["wt2"]), vec(p["ct2"]),
    ]

    row_spec = pl.BlockSpec((tm, H), lambda i: (i, 0))
    dt_spec = pl.BlockSpec((tm, 1), lambda i: (i, 0))

    def build_and_run(single_buffer_weights):
        if single_buffer_weights:
            def wspec(a):                      # resident weights, single pipeline buffer
                return pl.BlockSpec(a.shape, lambda i: (0, 0),
                                    pipeline_mode=pl.Buffered(1))
        else:
            def wspec(a):                      # fallback: default (double) buffering
                return pl.BlockSpec(a.shape, lambda i: (0, 0))

        call = pl.pallas_call(
            functools.partial(ltc_kernel, hidden_dim=H),
            out_shape=jax.ShapeDtypeStruct((M, H), out_dtype),
            grid_spec=pltpu.PrefetchScalarGridSpec(
                num_scalar_prefetch=0,
                grid=grid,
                in_specs=[row_spec, row_spec]
                         + [wspec(w) for w in weight_args]
                         + [dt_spec],
                out_specs=row_spec,
            ),
            compiler_params=pltpu.CompilerParams(
                dimension_semantics=("parallel",),
                vmem_limit_bytes=int(vmem_limit),
            ),
        )
        return call(x2, h2, *weight_args, dt_rows)

    try:
        out = build_and_run(True)
    except Exception:
        # Installed jax rejects pipeline_mode=pl.Buffered(1) for pallas_call inputs;
        # rebuild with default double-buffered resident weights (tiny VMEM cost here).
        out = build_and_run(False)

    return out.reshape(B, T, H)


def ltc_reference(x, h, dt, params):
    """Pure-JAX f32 reference of the PyTorch LTCLayer forward (3-D path)."""
    p = params

    def ln(v, g, b):
        mu = jnp.mean(v, axis=-1, keepdims=True)
        var = jnp.mean((v - mu) ** 2, axis=-1, keepdims=True)
        return (v - mu) / jnp.sqrt(var + LN_EPS) * g + b

    xn = ln(x, p["gs"], p["bs"])
    hn = ln(h, p["gs"], p["bs"])
    comb = jnp.concatenate([xn, hn], axis=-1)
    c_ln = ln(comb, p["g1"], p["b1"])
    t = jnp.tanh(c_ln @ p["w1"] + p["c1"])
    dh = t @ p["w2"] + p["c2"]
    h_ln = ln(hn, p["g2"], p["b2"])
    r = jax.nn.relu(h_ln @ p["wt1"] + p["ct1"])
    sig = jax.nn.sigmoid(r @ p["wt2"] + p["ct2"])
    tau = TAU_MIN + (TAU_MAX - TAU_MIN) * sig
    dt_b = dt.reshape(-1, 1, 1)
    return hn + (dh - hn) * dt_b / tau


def _run_case(key, B, T, H, dtype=jnp.float32, row_tile=None):
    kx, kh, kdt, kp = jax.random.split(key, 4)
    x = jax.random.normal(kx, (B, T, H), jnp.float32).astype(dtype)
    h = jax.random.normal(kh, (B, T, H), jnp.float32).astype(dtype)
    # dt near the module's default of 0.1
    dt = jax.random.uniform(kdt, (B,), jnp.float32, 0.05, 0.2)
    params = init_params(kp, H)

    out = jax.block_until_ready(ltc_forward(x, h, dt, params, row_tile=row_tile))
    ref = ltc_reference(x.astype(jnp.float32), h.astype(jnp.float32), dt, params)

    assert out.shape == (B, T, H)
    assert out.dtype == dtype
    out_f32 = out.astype(jnp.float32)
    err = float(jnp.max(jnp.abs(out_f32 - ref)))
    # bf16 MXU operands / bf16 IO + approx reciprocal vs a pure-f32 reference.
    assert jnp.allclose(out_f32, ref, atol=3e-2, rtol=3e-2), f"max abs err {err}"
    return err


if __name__ == "__main__":
    key = jax.random.PRNGKey(0)
    k1, k2 = jax.random.split(key)

    # Small shape consistent with the module (batch=2, seq=8, hidden=32), f32 IO,
    # single full block (M=16, H=32 used unpadded as full-extent block dims).
    _run_case(k1, B=2, T=8, H=32, dtype=jnp.float32)

    # Larger shape with bf16 activation streaming + bf16 output, multi-step row
    # tiling with a ragged last block (M=1500, tm=512 -> grid=3, remainder 476)
    # and a non-128-multiple hidden dim (H=192, no padding / slicing).
    _run_case(k2, B=3, T=500, H=192, dtype=jnp.bfloat16, row_tile=512)

    print("KERNEL_OK")
</pallas_src>

<mosaic_0001>
module attributes {stable_mosaic.version = 11 : i64} {
  func.func @ltc_kernel(%arg0: i32, %arg1: memref<16x32xf32, #tpu.memory_space<vmem>>, %arg2: memref<16x32xf32, #tpu.memory_space<vmem>>, %arg3: memref<1x32xf32, #tpu.memory_space<vmem>>, %arg4: memref<1x32xf32, #tpu.memory_space<vmem>>, %arg5: memref<1x32xf32, #tpu.memory_space<vmem>>, %arg6: memref<1x32xf32, #tpu.memory_space<vmem>>, %arg7: memref<1x32xf32, #tpu.memory_space<vmem>>, %arg8: memref<1x32xf32, #tpu.memory_space<vmem>>, %arg9: memref<32x32xbf16, #tpu.memory_space<vmem>>, %arg10: memref<32x32xbf16, #tpu.memory_space<vmem>>, %arg11: memref<1x32xf32, #tpu.memory_space<vmem>>, %arg12: memref<32x32xbf16, #tpu.memory_space<vmem>>, %arg13: memref<1x32xf32, #tpu.memory_space<vmem>>, %arg14: memref<1x32xf32, #tpu.memory_space<vmem>>, %arg15: memref<1x32xf32, #tpu.memory_space<vmem>>, %arg16: memref<32x32xbf16, #tpu.memory_space<vmem>>, %arg17: memref<1x32xf32, #tpu.memory_space<vmem>>, %arg18: memref<32x32xbf16, #tpu.memory_space<vmem>>, %arg19: memref<1x32xf32, #tpu.memory_space<vmem>>, %arg20: memref<16x1xf32, #tpu.memory_space<vmem>>, %arg21: memref<16x32xf32, #tpu.memory_space<vmem>>) attributes {dimension_semantics = [#tpu.dimension_semantics<parallel>], iteration_bounds = array<i64: 1>, scalar_prefetch = 0 : i64, scratch_operands = 0 : i64, tpu.core_type = #tpu.core_type<tc>, window_params = [{transform_indices = @transform_0, window_bounds = array<i64: 16, 32>}, {transform_indices = @transform_1, window_bounds = array<i64: 16, 32>}, {pipeline_mode = #tpu.pipeline_mode<synchronous>, transform_indices = @transform_2, window_bounds = array<i64: 1, 32>}, {pipeline_mode = #tpu.pipeline_mode<synchronous>, transform_indices = @transform_3, window_bounds = array<i64: 1, 32>}, {pipeline_mode = #tpu.pipeline_mode<synchronous>, transform_indices = @transform_4, window_bounds = array<i64: 1, 32>}, {pipeline_mode = #tpu.pipeline_mode<synchronous>, transform_indices = @transform_5, window_bounds = array<i64: 1, 32>}, {pipeline_mode = #tpu.pipeline_mode<synchronous>, transform_indices = @transform_6, window_bounds = array<i64: 1, 32>}, {pipeline_mode = #tpu.pipeline_mode<synchronous>, transform_indices = @transform_7, window_bounds = array<i64: 1, 32>}, {pipeline_mode = #tpu.pipeline_mode<synchronous>, transform_indices = @transform_8, window_bounds = array<i64: 32, 32>}, {pipeline_mode = #tpu.pipeline_mode<synchronous>, transform_indices = @transform_9, window_bounds = array<i64: 32, 32>}, {pipeline_mode = #tpu.pipeline_mode<synchronous>, transform_indices = @transform_10, window_bounds = array<i64: 1, 32>}, {pipeline_mode = #tpu.pipeline_mode<synchronous>, transform_indices = @transform_11, window_bounds = array<i64: 32, 32>}, {pipeline_mode = #tpu.pipeline_mode<synchronous>, transform_indices = @transform_12, window_bounds = array<i64: 1, 32>}, {pipeline_mode = #tpu.pipeline_mode<synchronous>, transform_indices = @transform_13, window_bounds = array<i64: 1, 32>}, {pipeline_mode = #tpu.pipeline_mode<synchronous>, transform_indices = @transform_14, window_bounds = array<i64: 1, 32>}, {pipeline_mode = #tpu.pipeline_mode<synchronous>, transform_indices = @transform_15, window_bounds = array<i64: 32, 32>}, {pipeline_mode = #tpu.pipeline_mode<synchronous>, transform_indices = @transform_16, window_bounds = array<i64: 1, 32>}, {pipeline_mode = #tpu.pipeline_mode<synchronous>, transform_indices = @transform_17, window_bounds = array<i64: 32, 32>}, {pipeline_mode = #tpu.pipeline_mode<synchronous>, transform_indices = @transform_18, window_bounds = array<i64: 1, 32>}, {transform_indices = @transform_19, window_bounds = array<i64: 16, 1>}, {transform_indices = @transform_20, window_bounds = array<i64: 16, 32>}]} {
    %c0 = arith.constant 0 : index
    %c0_0 = arith.constant 0 : index
    %0 = vector.load %arg1[%c0, %c0_0] : memref<16x32xf32, #tpu.memory_space<vmem>>, vector<16x32xf32>
    %c0_1 = arith.constant 0 : index
    %c0_2 = arith.constant 0 : index
    %1 = vector.load %arg2[%c0_1, %c0_2] : memref<16x32xf32, #tpu.memory_space<vmem>>, vector<16x32xf32>
    %c0_3 = arith.constant 0 : index
    %c0_4 = arith.constant 0 : index
    %2 = vector.load %arg3[%c0_3, %c0_4] : memref<1x32xf32, #tpu.memory_space<vmem>>, vector<1x32xf32>
    %c0_5 = arith.constant 0 : index
    %c0_6 = arith.constant 0 : index
    %3 = vector.load %arg4[%c0_5, %c0_6] : memref<1x32xf32, #tpu.memory_space<vmem>>, vector<1x32xf32>
    %cst = arith.constant dense<0.000000e+00> : vector<16xf32>
    %4 = vector.multi_reduction <add>, %0, %cst [1] : vector<16x32xf32> to vector<16xf32>
    %5 = vector.shape_cast %4 : vector<16xf32> to vector<16x1xf32>
    %cst_7 = arith.constant 3.125000e-02 : f32
    %6 = vector.broadcast %cst_7 : f32 to vector<16x1xf32>
    %7 = arith.mulf %5, %6 : vector<16x1xf32>
    %8 = vector.broadcast %7 : vector<16x1xf32> to vector<16x32xf32>
    %9 = arith.subf %0, %8 : vector<16x32xf32>
    %10 = arith.mulf %9, %9 : vector<16x32xf32>
    %cst_8 = arith.constant dense<0.000000e+00> : vector<16xf32>
    %11 = vector.multi_reduction <add>, %10, %cst_8 [1] : vector<16x32xf32> to vector<16xf32>
    %12 = vector.shape_cast %11 : vector<16xf32> to vector<16x1xf32>
    %cst_9 = arith.constant 3.125000e-02 : f32
    %13 = vector.broadcast %cst_9 : f32 to vector<16x1xf32>
    %14 = arith.mulf %12, %13 : vector<16x1xf32>
    %cst_10 = arith.constant 9.99999974E-6 : f32
    %15 = vector.broadcast %cst_10 : f32 to vector<16x1xf32>
    %16 = arith.addf %14, %15 : vector<16x1xf32>
    %17 = math.rsqrt %16 : vector<16x1xf32>
    %18 = vector.broadcast %17 : vector<16x1xf32> to vector<16x32xf32>
    %19 = arith.mulf %9, %18 : vector<16x32xf32>
    %20 = vector.broadcast %2 : vector<1x32xf32> to vector<16x32xf32>
    %21 = arith.mulf %19, %20 : vector<16x32xf32>
    %22 = vector.broadcast %3 : vector<1x32xf32> to vector<16x32xf32>
    %23 = arith.addf %21, %22 : vector<16x32xf32>
    %cst_11 = arith.constant dense<0.000000e+00> : vector<16xf32>
    %24 = vector.multi_reduction <add>, %1, %cst_11 [1] : vector<16x32xf32> to vector<16xf32>
    %25 = vector.shape_cast %24 : vector<16xf32> to vector<16x1xf32>
    %cst_12 = arith.constant 3.125000e-02 : f32
    %26 = vector.broadcast %cst_12 : f32 to vector<16x1xf32>
    %27 = arith.mulf %25, %26 : vector<16x1xf32>
    %28 = vector.broadcast %27 : vector<16x1xf32> to vector<16x32xf32>
    %29 = arith.subf %1, %28 : vector<16x32xf32>
    %30 = arith.mulf %29, %29 : vector<16x32xf32>
    %cst_13 = arith.constant dense<0.000000e+00> : vector<16xf32>
    %31 = vector.multi_reduction <add>, %30, %cst_13 [1] : vector<16x32xf32> to vector<16xf32>
    %32 = vector.shape_cast %31 : vector<16xf32> to vector<16x1xf32>
    %cst_14 = arith.constant 3.125000e-02 : f32
    %33 = vector.broadcast %cst_14 : f32 to vector<16x1xf32>
    %34 = arith.mulf %32, %33 : vector<16x1xf32>
    %cst_15 = arith.constant 9.99999974E-6 : f32
    %35 = vector.broadcast %cst_15 : f32 to vector<16x1xf32>
    %36 = arith.addf %34, %35 : vector<16x1xf32>
    %37 = math.rsqrt %36 : vector<16x1xf32>
    %38 = vector.broadcast %37 : vector<16x1xf32> to vector<16x32xf32>
    %39 = arith.mulf %29, %38 : vector<16x32xf32>
    %40 = vector.broadcast %2 : vector<1x32xf32> to vector<16x32xf32>
    %41 = arith.mulf %39, %40 : vector<16x32xf32>
    %42 = vector.broadcast %3 : vector<1x32xf32> to vector<16x32xf32>
    %43 = arith.addf %41, %42 : vector<16x32xf32>
    %cst_16 = arith.constant dense<0.000000e+00> : vector<16xf32>
    %44 = vector.multi_reduction <add>, %23, %cst_16 [1] : vector<16x32xf32> to vector<16xf32>
    %45 = vector.shape_cast %44 : vector<16xf32> to vector<16x1xf32>
    %46 = arith.mulf %23, %23 : vector<16x32xf32>
    %cst_17 = arith.constant dense<0.000000e+00> : vector<16xf32>
    %47 = vector.multi_reduction <add>, %46, %cst_17 [1] : vector<16x32xf32> to vector<16xf32>
    %48 = vector.shape_cast %47 : vector<16xf32> to vector<16x1xf32>
    %cst_18 = arith.constant dense<0.000000e+00> : vector<16xf32>
    %49 = vector.multi_reduction <add>, %43, %cst_18 [1] : vector<16x32xf32> to vector<16xf32>
    %50 = vector.shape_cast %49 : vector<16xf32> to vector<16x1xf32>
    %51 = arith.mulf %43, %43 : vector<16x32xf32>
    %cst_19 = arith.constant dense<0.000000e+00> : vector<16xf32>
    %52 = vector.multi_reduction <add>, %51, %cst_19 [1] : vector<16x32xf32> to vector<16xf32>
    %53 = vector.shape_cast %52 : vector<16xf32> to vector<16x1xf32>
    %54 = arith.addf %45, %50 : vector<16x1xf32>
    %cst_20 = arith.constant 1.562500e-02 : f32
    %55 = vector.broadcast %cst_20 : f32 to vector<16x1xf32>
    %56 = arith.mulf %54, %55 : vector<16x1xf32>
    %57 = arith.addf %48, %53 : vector<16x1xf32>
    %cst_21 = arith.constant 1.562500e-02 : f32
    %58 = vector.broadcast %cst_21 : f32 to vector<16x1xf32>
    %59 = arith.mulf %57, %58 : vector<16x1xf32>
    %60 = arith.mulf %56, %56 : vector<16x1xf32>
    %61 = arith.subf %59, %60 : vector<16x1xf32>
    %cst_22 = arith.constant 9.99999974E-6 : f32
    %62 = vector.broadcast %cst_22 : f32 to vector<16x1xf32>
    %63 = arith.addf %61, %62 : vector<16x1xf32>
    %64 = math.rsqrt %63 : vector<16x1xf32>
    %65 = vector.broadcast %56 : vector<16x1xf32> to vector<16x32xf32>
    %66 = arith.subf %23, %65 : vector<16x32xf32>
    %67 = vector.broadcast %64 : vector<16x1xf32> to vector<16x32xf32>
    %68 = arith.mulf %66, %67 : vector<16x32xf32>
    %c0_23 = arith.constant 0 : index
    %c0_24 = arith.constant 0 : index
    %69 = vector.load %arg5[%c0_23, %c0_24] : memref<1x32xf32, #tpu.memory_space<vmem>>, vector<1x32xf32>
    %70 = vector.broadcast %69 : vector<1x32xf32> to vector<16x32xf32>
    %71 = arith.mulf %68, %70 : vector<16x32xf32>
    %c0_25 = arith.constant 0 : index
    %c0_26 = arith.constant 0 : index
    %72 = vector.load %arg6[%c0_25, %c0_26] : memref<1x32xf32, #tpu.memory_space<vmem>>, vector<1x32xf32>
    %73 = vector.broadcast %72 : vector<1x32xf32> to vector<16x32xf32>
    %74 = arith.addf %71, %73 : vector<16x32xf32>
    %75 = arith.truncf %74 : vector<16x32xf32> to vector<16x32xbf16>
    %76 = vector.broadcast %56 : vector<16x1xf32> to vector<16x32xf32>
    %77 = arith.subf %43, %76 : vector<16x32xf32>
    %78 = vector.broadcast %64 : vector<16x1xf32> to vector<16x32xf32>
    %79 = arith.mulf %77, %78 : vector<16x32xf32>
    %c0_27 = arith.constant 0 : index
    %c0_28 = arith.constant 0 : index
    %80 = vector.load %arg7[%c0_27, %c0_28] : memref<1x32xf32, #tpu.memory_space<vmem>>, vector<1x32xf32>
    %81 = vector.broadcast %80 : vector<1x32xf32> to vector<16x32xf32>
    %82 = arith.mulf %79, %81 : vector<16x32xf32>
    %c0_29 = arith.constant 0 : index
    %c0_30 = arith.constant 0 : index
    %83 = vector.load %arg8[%c0_29, %c0_30] : memref<1x32xf32, #tpu.memory_space<vmem>>, vector<1x32xf32>
    %84 = vector.broadcast %83 : vector<1x32xf32> to vector<16x32xf32>
    %85 = arith.addf %82, %84 : vector<16x32xf32>
    %86 = arith.truncf %85 : vector<16x32xf32> to vector<16x32xbf16>
    %c0_31 = arith.constant 0 : index
    %c0_32 = arith.constant 0 : index
    %87 = vector.load %arg9[%c0_31, %c0_32] : memref<32x32xbf16, #tpu.memory_space<vmem>>, vector<32x32xbf16>
    %cst_33 = arith.constant dense<0.000000e+00> : vector<16x32xf32>
    %88 = tpu.matmul %75, %87, %cst_33 {dimension_numbers = #tpu.dot_dimension_numbers<[1], [0], [0], [1], [0, 0, 1, 1], [], []>} : vector<16x32xbf16>, vector<32x32xbf16>, vector<16x32xf32> -> vector<16x32xf32>
    %c0_34 = arith.constant 0 : index
    %c0_35 = arith.constant 0 : index
    %89 = vector.load %arg10[%c0_34, %c0_35] : memref<32x32xbf16, #tpu.memory_space<vmem>>, vector<32x32xbf16>
    %cst_36 = arith.constant dense<0.000000e+00> : vector<16x32xf32>
    %90 = tpu.matmul %86, %89, %cst_36 {dimension_numbers = #tpu.dot_dimension_numbers<[1], [0], [0], [1], [0, 0, 1, 1], [], []>} : vector<16x32xbf16>, vector<32x32xbf16>, vector<16x32xf32> -> vector<16x32xf32>
    %91 = arith.addf %88, %90 : vector<16x32xf32>
    %c0_37 = arith.constant 0 : index
    %c0_38 = arith.constant 0 : index
    %92 = vector.load %arg11[%c0_37, %c0_38] : memref<1x32xf32, #tpu.memory_space<vmem>>, vector<1x32xf32>
    %93 = vector.broadcast %92 : vector<1x32xf32> to vector<16x32xf32>
    %94 = arith.addf %91, %93 : vector<16x32xf32>
    %95 = math.tanh %94 : vector<16x32xf32>
    %96 = arith.truncf %95 : vector<16x32xf32> to vector<16x32xbf16>
    %c0_39 = arith.constant 0 : index
    %c0_40 = arith.constant 0 : index
    %97 = vector.load %arg12[%c0_39, %c0_40] : memref<32x32xbf16, #tpu.memory_space<vmem>>, vector<32x32xbf16>
    %cst_41 = arith.constant dense<0.000000e+00> : vector<16x32xf32>
    %98 = tpu.matmul %96, %97, %cst_41 {dimension_numbers = #tpu.dot_dimension_numbers<[1], [0], [0], [1], [0, 0, 1, 1], [], []>} : vector<16x32xbf16>, vector<32x32xbf16>, vector<16x32xf32> -> vector<16x32xf32>
    %c0_42 = arith.constant 0 : index
    %c0_43 = arith.constant 0 : index
    %99 = vector.load %arg13[%c0_42, %c0_43] : memref<1x32xf32, #tpu.memory_space<vmem>>, vector<1x32xf32>
    %100 = vector.broadcast %99 : vector<1x32xf32> to vector<16x32xf32>
    %101 = arith.addf %98, %100 : vector<16x32xf32>
    %cst_44 = arith.constant 3.125000e-02 : f32
    %102 = vector.broadcast %cst_44 : f32 to vector<16x1xf32>
    %103 = arith.mulf %50, %102 : vector<16x1xf32>
    %cst_45 = arith.constant 3.125000e-02 : f32
    %104 = vector.broadcast %cst_45 : f32 to vector<16x1xf32>
    %105 = arith.mulf %53, %104 : vector<16x1xf32>
    %106 = arith.mulf %103, %103 : vector<16x1xf32>
    %107 = arith.subf %105, %106 : vector<16x1xf32>
    %108 = vector.broadcast %103 : vector<16x1xf32> to vector<16x32xf32>
    %109 = arith.subf %43, %108 : vector<16x32xf32>
    %cst_46 = arith.constant 9.99999974E-6 : f32
    %110 = vector.broadcast %cst_46 : f32 to vector<16x1xf32>
    %111 = arith.addf %107, %110 : vector<16x1xf32>
    %112 = math.rsqrt %111 : vector<16x1xf32>
    %113 = vector.broadcast %112 : vector<16x1xf32> to vector<16x32xf32>
    %114 = arith.mulf %109, %113 : vector<16x32xf32>
    %c0_47 = arith.constant 0 : index
    %c0_48 = arith.constant 0 : index
    %115 = vector.load %arg14[%c0_47, %c0_48] : memref<1x32xf32, #tpu.memory_space<vmem>>, vector<1x32xf32>
    %116 = vector.broadcast %115 : vector<1x32xf32> to vector<16x32xf32>
    %117 = arith.mulf %114, %116 : vector<16x32xf32>
    %c0_49 = arith.constant 0 : index
    %c0_50 = arith.constant 0 : index
    %118 = vector.load %arg15[%c0_49, %c0_50] : memref<1x32xf32, #tpu.memory_space<vmem>>, vector<1x32xf32>
    %119 = vector.broadcast %118 : vector<1x32xf32> to vector<16x32xf32>
    %120 = arith.addf %117, %119 : vector<16x32xf32>
    %121 = arith.truncf %120 : vector<16x32xf32> to vector<16x32xbf16>
    %c0_51 = arith.constant 0 : index
    %c0_52 = arith.constant 0 : index
    %122 = vector.load %arg16[%c0_51, %c0_52] : memref<32x32xbf16, #tpu.memory_space<vmem>>, vector<32x32xbf16>
    %cst_53 = arith.constant dense<0.000000e+00> : vector<16x32xf32>
    %123 = tpu.matmul %121, %122, %cst_53 {dimension_numbers = #tpu.dot_dimension_numbers<[1], [0], [0], [1], [0, 0, 1, 1], [], []>} : vector<16x32xbf16>, vector<32x32xbf16>, vector<16x32xf32> -> vector<16x32xf32>
    %c0_54 = arith.constant 0 : index
    %c0_55 = arith.constant 0 : index
    %124 = vector.load %arg17[%c0_54, %c0_55] : memref<1x32xf32, #tpu.memory_space<vmem>>, vector<1x32xf32>
    %125 = vector.broadcast %124 : vector<1x32xf32> to vector<16x32xf32>
    %126 = arith.addf %123, %125 : vector<16x32xf32>
    %cst_56 = arith.constant 0.000000e+00 : f32
    %127 = vector.broadcast %cst_56 : f32 to vector<16x32xf32>
    %128 = arith.maximumf %126, %127 : vector<16x32xf32>
    %129 = arith.truncf %128 : vector<16x32xf32> to vector<16x32xbf16>
    %c0_57 = arith.constant 0 : index
    %c0_58 = arith.constant 0 : index
    %130 = vector.load %arg18[%c0_57, %c0_58] : memref<32x32xbf16, #tpu.memory_space<vmem>>, vector<32x32xbf16>
    %cst_59 = arith.constant dense<0.000000e+00> : vector<16x32xf32>
    %131 = tpu.matmul %129, %130, %cst_59 {dimension_numbers = #tpu.dot_dimension_numbers<[1], [0], [0], [1], [0, 0, 1, 1], [], []>} : vector<16x32xbf16>, vector<32x32xbf16>, vector<16x32xf32> -> vector<16x32xf32>
    %c0_60 = arith.constant 0 : index
    %c0_61 = arith.constant 0 : index
    %132 = vector.load %arg19[%c0_60, %c0_61] : memref<1x32xf32, #tpu.memory_space<vmem>>, vector<1x32xf32>
    %133 = vector.broadcast %132 : vector<1x32xf32> to vector<16x32xf32>
    %134 = arith.addf %131, %133 : vector<16x32xf32>
    %135 = arith.negf %134 : vector<16x32xf32>
    %136 = math.exp %135 : vector<16x32xf32>
    %cst_62 = arith.constant 1.000000e+00 : f32
    %137 = vector.broadcast %cst_62 : f32 to vector<16x32xf32>
    %138 = arith.addf %137, %136 : vector<16x32xf32>
    %139 = arith.divf %137, %138 : vector<16x32xf32>
    %cst_63 = arith.constant 9.900000e+01 : f32
    %140 = vector.broadcast %cst_63 : f32 to vector<16x32xf32>
    %141 = arith.mulf %140, %139 : vector<16x32xf32>
    %cst_64 = arith.constant 1.000000e+00 : f32
    %142 = vector.broadcast %cst_64 : f32 to vector<16x32xf32>
    %143 = arith.addf %142, %141 : vector<16x32xf32>
    %c0_65 = arith.constant 0 : index
    %c0_66 = arith.constant 0 : index
    %144 = vector.load %arg20[%c0_65, %c0_66] : memref<16x1xf32, #tpu.memory_space<vmem>>, vector<16x1xf32>
    %145 = tpu.reciprocal %143 {approx = true} : vector<16x32xf32> -> vector<16x32xf32>
    %146 = vector.broadcast %144 : vector<16x1xf32> to vector<16x32xf32>
    %147 = arith.mulf %146, %145 : vector<16x32xf32>
    %148 = arith.subf %101, %43 : vector<16x32xf32>
    %149 = arith.mulf %148, %147 : vector<16x32xf32>
    %150 = arith.addf %43, %149 : vector<16x32xf32>
    %c0_67 = arith.constant 0 : index
    %c0_68 = arith.constant 0 : index
    %151 = vector.load %arg21[%c0_67, %c0_68] : memref<16x32xf32, #tpu.memory_space<vmem>>, vector<16x32xf32>
    tpu.vector_store %arg21[%c0_67, %c0_68], %150 {strides = array<i32>} : memref<16x32xf32, #tpu.memory_space<vmem>>, vector<16x32xf32>,
    return
  }
  func.func @transform_0(%arg0: i32) -> (i32, i32) {
    %c0_i32 = arith.constant 0 : i32
    %c0_i32_0 = arith.constant 0 : i32
    return %arg0, %c0_i32 : i32, i32
  }
  func.func @transform_1(%arg0: i32) -> (i32, i32) {
    %c0_i32 = arith.constant 0 : i32
    %c0_i32_0 = arith.constant 0 : i32
    return %arg0, %c0_i32 : i32, i32
  }
  func.func @transform_2(%arg0: i32) -> (i32, i32) {
    %c0_i32 = arith.constant 0 : i32
    %c0_i32_0 = arith.constant 0 : i32
    %c0_i32_1 = arith.constant 0 : i32
    return %c0_i32, %c0_i32_0 : i32, i32
  }
  func.func @transform_3(%arg0: i32) -> (i32, i32) {
    %c0_i32 = arith.constant 0 : i32
    %c0_i32_0 = arith.constant 0 : i32
    %c0_i32_1 = arith.constant 0 : i32
    return %c0_i32, %c0_i32_0 : i32, i32
  }
  func.func @transform_4(%arg0: i32) -> (i32, i32) {
    %c0_i32 = arith.constant 0 : i32
    %c0_i32_0 = arith.constant 0 : i32
    %c0_i32_1 = arith.constant 0 : i32
    return %c0_i32, %c0_i32_0 : i32, i32
  }
  func.func @transform_5(%arg0: i32) -> (i32, i32) {
    %c0_i32 = arith.constant 0 : i32
    %c0_i32_0 = arith.constant 0 : i32
    %c0_i32_1 = arith.constant 0 : i32
    return %c0_i32, %c0_i32_0 : i32, i32
  }
  func.func @transform_6(%arg0: i32) -> (i32, i32) {
    %c0_i32 = arith.constant 0 : i32
    %c0_i32_0 = arith.constant 0 : i32
    %c0_i32_1 = arith.constant 0 : i32
    return %c0_i32, %c0_i32_0 : i32, i32
  }
  func.func @transform_7(%arg0: i32) -> (i32, i32) {
    %c0_i32 = arith.constant 0 : i32
    %c0_i32_0 = arith.constant 0 : i32
    %c0_i32_1 = arith.constant 0 : i32
    return %c0_i32, %c0_i32_0 : i32, i32
  }
  func.func @transform_8(%arg0: i32) -> (i32, i32) {
    %c0_i32 = arith.constant 0 : i32
    %c0_i32_0 = arith.constant 0 : i32
    %c0_i32_1 = arith.constant 0 : i32
    return %c0_i32, %c0_i32_0 : i32, i32
  }
  func.func @transform_9(%arg0: i32) -> (i32, i32) {
    %c0_i32 = arith.constant 0 : i32
    %c0_i32_0 = arith.constant 0 : i32
    %c0_i32_1 = arith.constant 0 : i32
    return %c0_i32, %c0_i32_0 : i32, i32
  }
  func.func @transform_10(%arg0: i32) -> (i32, i32) {
    %c0_i32 = arith.constant 0 : i32
    %c0_i32_0 = arith.constant 0 : i32
    %c0_i32_1 = arith.constant 0 : i32
    return %c0_i32, %c0_i32_0 : i32, i32
  }
  func.func @transform_11(%arg0: i32) -> (i32, i32) {
    %c0_i32 = arith.constant 0 : i32
    %c0_i32_0 = arith.constant 0 : i32
    %c0_i32_1 = arith.constant 0 : i32
    return %c0_i32, %c0_i32_0 : i32, i32
  }
  func.func @transform_12(%arg0: i32) -> (i32, i32) {
    %c0_i32 = arith.constant 0 : i32
    %c0_i32_0 = arith.constant 0 : i32
    %c0_i32_1 = arith.constant 0 : i32
    return %c0_i32, %c0_i32_0 : i32, i32
  }
  func.func @transform_13(%arg0: i32) -> (i32, i32) {
    %c0_i32 = arith.constant 0 : i32
    %c0_i32_0 = arith.constant 0 : i32
    %c0_i32_1 = arith.constant 0 : i32
    return %c0_i32, %c0_i32_0 : i32, i32
  }
  func.func @transform_14(%arg0: i32) -> (i32, i32) {
    %c0_i32 = arith.constant 0 : i32
    %c0_i32_0 = arith.constant 0 : i32
    %c0_i32_1 = arith.constant 0 : i32
    return %c0_i32, %c0_i32_0 : i32, i32
  }
  func.func @transform_15(%arg0: i32) -> (i32, i32) {
    %c0_i32 = arith.constant 0 : i32
    %c0_i32_0 = arith.constant 0 : i32
    %c0_i32_1 = arith.constant 0 : i32
    return %c0_i32, %c0_i32_0 : i32, i32
  }
  func.func @transform_16(%arg0: i32) -> (i32, i32) {
    %c0_i32 = arith.constant 0 : i32
    %c0_i32_0 = arith.constant 0 : i32
    %c0_i32_1 = arith.constant 0 : i32
    return %c0_i32, %c0_i32_0 : i32, i32
  }
  func.func @transform_17(%arg0: i32) -> (i32, i32) {
    %c0_i32 = arith.constant 0 : i32
    %c0_i32_0 = arith.constant 0 : i32
    %c0_i32_1 = arith.constant 0 : i32
    return %c0_i32, %c0_i32_0 : i32, i32
  }
  func.func @transform_18(%arg0: i32) -> (i32, i32) {
    %c0_i32 = arith.constant 0 : i32
    %c0_i32_0 = arith.constant 0 : i32
    %c0_i32_1 = arith.constant 0 : i32
    return %c0_i32, %c0_i32_0 : i32, i32
  }
  func.func @transform_19(%arg0: i32) -> (i32, i32) {
    %c0_i32 = arith.constant 0 : i32
    %c0_i32_0 = arith.constant 0 : i32
    return %arg0, %c0_i32 : i32, i32
  }
  func.func @transform_20(%arg0: i32) -> (i32, i32) {
    %c0_i32 = arith.constant 0 : i32
    %c0_i32_0 = arith.constant 0 : i32
    return %arg0, %c0_i32 : i32, i32
  }
}

module attributes {stable_mosaic.version = 11 : i64} {
  func.func @ltc_kernel(%arg0: i32, %arg1: memref<16x32xf32, #tpu.memory_space<vmem>>, %arg2: memref<16x32xf32, #tpu.memory_space<vmem>>, %arg3: memref<1x32xf32, #tpu.memory_space<vmem>>, %arg4: memref<1x32xf32, #tpu.memory_space<vmem>>, %arg5: memref<1x32xf32, #tpu.memory_space<vmem>>, %arg6: memref<1x32xf32, #tpu.memory_space<vmem>>, %arg7: memref<1x32xf32, #tpu.memory_space<vmem>>, %arg8: memref<1x32xf32, #tpu.memory_space<vmem>>, %arg9: memref<32x32xbf16, #tpu.memory_space<vmem>>, %arg10: memref<32x32xbf16, #tpu.memory_space<vmem>>, %arg11: memref<1x32xf32, #tpu.memory_space<vmem>>, %arg12: memref<32x32xbf16, #tpu.memory_space<vmem>>, %arg13: memref<1x32xf32, #tpu.memory_space<vmem>>, %arg14: memref<1x32xf32, #tpu.memory_space<vmem>>, %arg15: memref<1x32xf32, #tpu.memory_space<vmem>>, %arg16: memref<32x32xbf16, #tpu.memory_space<vmem>>, %arg17: memref<1x32xf32, #tpu.memory_space<vmem>>, %arg18: memref<32x32xbf16, #tpu.memory_space<vmem>>, %arg19: memref<1x32xf32, #tpu.memory_space<vmem>>, %arg20: memref<16x1xf32, #tpu.memory_space<vmem>>, %arg21: memref<16x32xf32, #tpu.memory_space<vmem>>) attributes {dimension_semantics = [#tpu.dimension_semantics<parallel>], iteration_bounds = array<i64: 1>, scalar_prefetch = 0 : i64, scratch_operands = 0 : i64, tpu.core_type = #tpu.core_type<tc>, window_params = [{transform_indices = @transform_0, window_bounds = array<i64: 16, 32>}, {transform_indices = @transform_1, window_bounds = array<i64: 16, 32>}, {pipeline_mode = #tpu.pipeline_mode<synchronous>, transform_indices = @transform_2, window_bounds = array<i64: 1, 32>}, {pipeline_mode = #tpu.pipeline_mode<synchronous>, transform_indices = @transform_3, window_bounds = array<i64: 1, 32>}, {pipeline_mode = #tpu.pipeline_mode<synchronous>, transform_indices = @transform_4, window_bounds = array<i64: 1, 32>}, {pipeline_mode = #tpu.pipeline_mode<synchronous>, transform_indices = @transform_5, window_bounds = array<i64: 1, 32>}, {pipeline_mode = #tpu.pipeline_mode<synchronous>, transform_indices = @transform_6, window_bounds = array<i64: 1, 32>}, {pipeline_mode = #tpu.pipeline_mode<synchronous>, transform_indices = @transform_7, window_bounds = array<i64: 1, 32>}, {pipeline_mode = #tpu.pipeline_mode<synchronous>, transform_indices = @transform_8, window_bounds = array<i64: 32, 32>}, {pipeline_mode = #tpu.pipeline_mode<synchronous>, transform_indices = @transform_9, window_bounds = array<i64: 32, 32>}, {pipeline_mode = #tpu.pipeline_mode<synchronous>, transform_indices = @transform_10, window_bounds = array<i64: 1, 32>}, {pipeline_mode = #tpu.pipeline_mode<synchronous>, transform_indices = @transform_11, window_bounds = array<i64: 32, 32>}, {pipeline_mode = #tpu.pipeline_mode<synchronous>, transform_indices = @transform_12, window_bounds = array<i64: 1, 32>}, {pipeline_mode = #tpu.pipeline_mode<synchronous>, transform_indices = @transform_13, window_bounds = array<i64: 1, 32>}, {pipeline_mode = #tpu.pipeline_mode<synchronous>, transform_indices = @transform_14, window_bounds = array<i64: 1, 32>}, {pipeline_mode = #tpu.pipeline_mode<synchronous>, transform_indices = @transform_15, window_bounds = array<i64: 32, 32>}, {pipeline_mode = #tpu.pipeline_mode<synchronous>, transform_indices = @transform_16, window_bounds = array<i64: 1, 32>}, {pipeline_mode = #tpu.pipeline_mode<synchronous>, transform_indices = @transform_17, window_bounds = array<i64: 32, 32>}, {pipeline_mode = #tpu.pipeline_mode<synchronous>, transform_indices = @transform_18, window_bounds = array<i64: 1, 32>}, {transform_indices = @transform_19, window_bounds = array<i64: 16, 1>}, {transform_indices = @transform_20, window_bounds = array<i64: 16, 32>}]} {
    %c0 = arith.constant 0 : index
    %c0_0 = arith.constant 0 : index
    %0 = vector.load %arg1[%c0, %c0_0] : memref<16x32xf32, #tpu.memory_space<vmem>>, vector<16x32xf32>
    %c0_1 = arith.constant 0 : index
    %c0_2 = arith.constant 0 : index
    %1 = vector.load %arg2[%c0_1, %c0_2] : memref<16x32xf32, #tpu.memory_space<vmem>>, vector<16x32xf32>
    %c0_3 = arith.constant 0 : index
    %c0_4 = arith.constant 0 : index
    %2 = vector.load %arg3[%c0_3, %c0_4] : memref<1x32xf32, #tpu.memory_space<vmem>>, vector<1x32xf32>
    %c0_5 = arith.constant 0 : index
    %c0_6 = arith.constant 0 : index
    %3 = vector.load %arg4[%c0_5, %c0_6] : memref<1x32xf32, #tpu.memory_space<vmem>>, vector<1x32xf32>
    %cst = arith.constant dense<0.000000e+00> : vector<16xf32>
    %4 = vector.multi_reduction <add>, %0, %cst [1] : vector<16x32xf32> to vector<16xf32>
    %5 = vector.shape_cast %4 : vector<16xf32> to vector<16x1xf32>
    %cst_7 = arith.constant 3.125000e-02 : f32
    %6 = vector.broadcast %cst_7 : f32 to vector<16x1xf32>
    %7 = arith.mulf %5, %6 : vector<16x1xf32>
    %8 = vector.broadcast %7 : vector<16x1xf32> to vector<16x32xf32>
    %9 = arith.subf %0, %8 : vector<16x32xf32>
    %10 = arith.mulf %9, %9 : vector<16x32xf32>
    %cst_8 = arith.constant dense<0.000000e+00> : vector<16xf32>
    %11 = vector.multi_reduction <add>, %10, %cst_8 [1] : vector<16x32xf32> to vector<16xf32>
    %12 = vector.shape_cast %11 : vector<16xf32> to vector<16x1xf32>
    %cst_9 = arith.constant 3.125000e-02 : f32
    %13 = vector.broadcast %cst_9 : f32 to vector<16x1xf32>
    %14 = arith.mulf %12, %13 : vector<16x1xf32>
    %cst_10 = arith.constant 9.99999974E-6 : f32
    %15 = vector.broadcast %cst_10 : f32 to vector<16x1xf32>
    %16 = arith.addf %14, %15 : vector<16x1xf32>
    %17 = math.rsqrt %16 : vector<16x1xf32>
    %18 = vector.broadcast %17 : vector<16x1xf32> to vector<16x32xf32>
    %19 = arith.mulf %9, %18 : vector<16x32xf32>
    %20 = vector.broadcast %2 : vector<1x32xf32> to vector<16x32xf32>
    %21 = arith.mulf %19, %20 : vector<16x32xf32>
    %22 = vector.broadcast %3 : vector<1x32xf32> to vector<16x32xf32>
    %23 = arith.addf %21, %22 : vector<16x32xf32>
    %cst_11 = arith.constant dense<0.000000e+00> : vector<16xf32>
    %24 = vector.multi_reduction <add>, %1, %cst_11 [1] : vector<16x32xf32> to vector<16xf32>
    %25 = vector.shape_cast %24 : vector<16xf32> to vector<16x1xf32>
    %cst_12 = arith.constant 3.125000e-02 : f32
    %26 = vector.broadcast %cst_12 : f32 to vector<16x1xf32>
    %27 = arith.mulf %25, %26 : vector<16x1xf32>
    %28 = vector.broadcast %27 : vector<16x1xf32> to vector<16x32xf32>
    %29 = arith.subf %1, %28 : vector<16x32xf32>
    %30 = arith.mulf %29, %29 : vector<16x32xf32>
    %cst_13 = arith.constant dense<0.000000e+00> : vector<16xf32>
    %31 = vector.multi_reduction <add>, %30, %cst_13 [1] : vector<16x32xf32> to vector<16xf32>
    %32 = vector.shape_cast %31 : vector<16xf32> to vector<16x1xf32>
    %cst_14 = arith.constant 3.125000e-02 : f32
    %33 = vector.broadcast %cst_14 : f32 to vector<16x1xf32>
    %34 = arith.mulf %32, %33 : vector<16x1xf32>
    %cst_15 = arith.constant 9.99999974E-6 : f32
    %35 = vector.broadcast %cst_15 : f32 to vector<16x1xf32>
    %36 = arith.addf %34, %35 : vector<16x1xf32>
    %37 = math.rsqrt %36 : vector<16x1xf32>
    %38 = vector.broadcast %37 : vector<16x1xf32> to vector<16x32xf32>
    %39 = arith.mulf %29, %38 : vector<16x32xf32>
    %40 = vector.broadcast %2 : vector<1x32xf32> to vector<16x32xf32>
    %41 = arith.mulf %39, %40 : vector<16x32xf32>
    %42 = vector.broadcast %3 : vector<1x32xf32> to vector<16x32xf32>
    %43 = arith.addf %41, %42 : vector<16x32xf32>
    %cst_16 = arith.constant dense<0.000000e+00> : vector<16xf32>
    %44 = vector.multi_reduction <add>, %23, %cst_16 [1] : vector<16x32xf32> to vector<16xf32>
    %45 = vector.shape_cast %44 : vector<16xf32> to vector<16x1xf32>
    %46 = arith.mulf %23, %23 : vector<16x32xf32>
    %cst_17 = arith.constant dense<0.000000e+00> : vector<16xf32>
    %47 = vector.multi_reduction <add>, %46, %cst_17 [1] : vector<16x32xf32> to vector<16xf32>
    %48 = vector.shape_cast %47 : vector<16xf32> to vector<16x1xf32>
    %cst_18 = arith.constant dense<0.000000e+00> : vector<16xf32>
    %49 = vector.multi_reduction <add>, %43, %cst_18 [1] : vector<16x32xf32> to vector<16xf32>
    %50 = vector.shape_cast %49 : vector<16xf32> to vector<16x1xf32>
    %51 = arith.mulf %43, %43 : vector<16x32xf32>
    %cst_19 = arith.constant dense<0.000000e+00> : vector<16xf32>
    %52 = vector.multi_reduction <add>, %51, %cst_19 [1] : vector<16x32xf32> to vector<16xf32>
    %53 = vector.shape_cast %52 : vector<16xf32> to vector<16x1xf32>
    %54 = arith.addf %45, %50 : vector<16x1xf32>
    %cst_20 = arith.constant 1.562500e-02 : f32
    %55 = vector.broadcast %cst_20 : f32 to vector<16x1xf32>
    %56 = arith.mulf %54, %55 : vector<16x1xf32>
    %57 = arith.addf %48, %53 : vector<16x1xf32>
    %cst_21 = arith.constant 1.562500e-02 : f32
    %58 = vector.broadcast %cst_21 : f32 to vector<16x1xf32>
    %59 = arith.mulf %57, %58 : vector<16x1xf32>
    %60 = arith.mulf %56, %56 : vector<16x1xf32>
    %61 = arith.subf %59, %60 : vector<16x1xf32>
    %cst_22 = arith.constant 9.99999974E-6 : f32
    %62 = vector.broadcast %cst_22 : f32 to vector<16x1xf32>
    %63 = arith.addf %61, %62 : vector<16x1xf32>
    %64 = math.rsqrt %63 : vector<16x1xf32>
    %65 = vector.broadcast %56 : vector<16x1xf32> to vector<16x32xf32>
    %66 = arith.subf %23, %65 : vector<16x32xf32>
    %67 = vector.broadcast %64 : vector<16x1xf32> to vector<16x32xf32>
    %68 = arith.mulf %66, %67 : vector<16x32xf32>
    %c0_23 = arith.constant 0 : index
    %c0_24 = arith.constant 0 : index
    %69 = vector.load %arg5[%c0_23, %c0_24] : memref<1x32xf32, #tpu.memory_space<vmem>>, vector<1x32xf32>
    %70 = vector.broadcast %69 : vector<1x32xf32> to vector<16x32xf32>
    %71 = arith.mulf %68, %70 : vector<16x32xf32>
    %c0_25 = arith.constant 0 : index
    %c0_26 = arith.constant 0 : index
    %72 = vector.load %arg6[%c0_25, %c0_26] : memref<1x32xf32, #tpu.memory_space<vmem>>, vector<1x32xf32>
    %73 = vector.broadcast %72 : vector<1x32xf32> to vector<16x32xf32>
    %74 = arith.addf %71, %73 : vector<16x32xf32>
    %75 = arith.truncf %74 : vector<16x32xf32> to vector<16x32xbf16>
    %76 = vector.broadcast %56 : vector<16x1xf32> to vector<16x32xf32>
    %77 = arith.subf %43, %76 : vector<16x32xf32>
    %78 = vector.broadcast %64 : vector<16x1xf32> to vector<16x32xf32>
    %79 = arith.mulf %77, %78 : vector<16x32xf32>
    %c0_27 = arith.constant 0 : index
    %c0_28 = arith.constant 0 : index
    %80 = vector.load %arg7[%c0_27, %c0_28] : memref<1x32xf32, #tpu.memory_space<vmem>>, vector<1x32xf32>
    %81 = vector.broadcast %80 : vector<1x32xf32> to vector<16x32xf32>
    %82 = arith.mulf %79, %81 : vector<16x32xf32>
    %c0_29 = arith.constant 0 : index
    %c0_30 = arith.constant 0 : index
    %83 = vector.load %arg8[%c0_29, %c0_30] : memref<1x32xf32, #tpu.memory_space<vmem>>, vector<1x32xf32>
    %84 = vector.broadcast %83 : vector<1x32xf32> to vector<16x32xf32>
    %85 = arith.addf %82, %84 : vector<16x32xf32>
    %86 = arith.truncf %85 : vector<16x32xf32> to vector<16x32xbf16>
    %c0_31 = arith.constant 0 : index
    %c0_32 = arith.constant 0 : index
    %87 = vector.load %arg9[%c0_31, %c0_32] : memref<32x32xbf16, #tpu.memory_space<vmem>>, vector<32x32xbf16>
    %cst_33 = arith.constant dense<0.000000e+00> : vector<16x32xf32>
    %88 = tpu.matmul %75, %87, %cst_33 {dimension_numbers = #tpu.dot_dimension_numbers<[1], [0], [0], [1], [0, 0, 1, 1], [], []>} : vector<16x32xbf16>, vector<32x32xbf16>, vector<16x32xf32> -> vector<16x32xf32>
    %c0_34 = arith.constant 0 : index
    %c0_35 = arith.constant 0 : index
    %89 = vector.load %arg10[%c0_34, %c0_35] : memref<32x32xbf16, #tpu.memory_space<vmem>>, vector<32x32xbf16>
    %cst_36 = arith.constant dense<0.000000e+00> : vector<16x32xf32>
    %90 = tpu.matmul %86, %89, %cst_36 {dimension_numbers = #tpu.dot_dimension_numbers<[1], [0], [0], [1], [0, 0, 1, 1], [], []>} : vector<16x32xbf16>, vector<32x32xbf16>, vector<16x32xf32> -> vector<16x32xf32>
    %91 = arith.addf %88, %90 : vector<16x32xf32>
    %c0_37 = arith.constant 0 : index
    %c0_38 = arith.constant 0 : index
    %92 = vector.load %arg11[%c0_37, %c0_38] : memref<1x32xf32, #tpu.memory_space<vmem>>, vector<1x32xf32>
    %93 = vector.broadcast %92 : vector<1x32xf32> to vector<16x32xf32>
    %94 = arith.addf %91, %93 : vector<16x32xf32>
    %95 = math.tanh %94 : vector<16x32xf32>
    %96 = arith.truncf %95 : vector<16x32xf32> to vector<16x32xbf16>
    %c0_39 = arith.constant 0 : index
    %c0_40 = arith.constant 0 : index
    %97 = vector.load %arg12[%c0_39, %c0_40] : memref<32x32xbf16, #tpu.memory_space<vmem>>, vector<32x32xbf16>
    %cst_41 = arith.constant dense<0.000000e+00> : vector<16x32xf32>
    %98 = tpu.matmul %96, %97, %cst_41 {dimension_numbers = #tpu.dot_dimension_numbers<[1], [0], [0], [1], [0, 0, 1, 1], [], []>} : vector<16x32xbf16>, vector<32x32xbf16>, vector<16x32xf32> -> vector<16x32xf32>
    %c0_42 = arith.constant 0 : index
    %c0_43 = arith.constant 0 : index
    %99 = vector.load %arg13[%c0_42, %c0_43] : memref<1x32xf32, #tpu.memory_space<vmem>>, vector<1x32xf32>
    %100 = vector.broadcast %99 : vector<1x32xf32> to vector<16x32xf32>
    %101 = arith.addf %98, %100 : vector<16x32xf32>
    %cst_44 = arith.constant 3.125000e-02 : f32
    %102 = vector.broadcast %cst_44 : f32 to vector<16x1xf32>
    %103 = arith.mulf %50, %102 : vector<16x1xf32>
    %cst_45 = arith.constant 3.125000e-02 : f32
    %104 = vector.broadcast %cst_45 : f32 to vector<16x1xf32>
    %105 = arith.mulf %53, %104 : vector<16x1xf32>
    %106 = arith.mulf %103, %103 : vector<16x1xf32>
    %107 = arith.subf %105, %106 : vector<16x1xf32>
    %108 = vector.broadcast %103 : vector<16x1xf32> to vector<16x32xf32>
    %109 = arith.subf %43, %108 : vector<16x32xf32>
    %cst_46 = arith.constant 9.99999974E-6 : f32
    %110 = vector.broadcast %cst_46 : f32 to vector<16x1xf32>
    %111 = arith.addf %107, %110 : vector<16x1xf32>
    %112 = math.rsqrt %111 : vector<16x1xf32>
    %113 = vector.broadcast %112 : vector<16x1xf32> to vector<16x32xf32>
    %114 = arith.mulf %109, %113 : vector<16x32xf32>
    %c0_47 = arith.constant 0 : index
    %c0_48 = arith.constant 0 : index
    %115 = vector.load %arg14[%c0_47, %c0_48] : memref<1x32xf32, #tpu.memory_space<vmem>>, vector<1x32xf32>
    %116 = vector.broadcast %115 : vector<1x32xf32> to vector<16x32xf32>
    %117 = arith.mulf %114, %116 : vector<16x32xf32>
    %c0_49 = arith.constant 0 : index
    %c0_50 = arith.constant 0 : index
    %118 = vector.load %arg15[%c0_49, %c0_50] : memref<1x32xf32, #tpu.memory_space<vmem>>, vector<1x32xf32>
    %119 = vector.broadcast %118 : vector<1x32xf32> to vector<16x32xf32>
    %120 = arith.addf %117, %119 : vector<16x32xf32>
    %121 = arith.truncf %120 : vector<16x32xf32> to vector<16x32xbf16>
    %c0_51 = arith.constant 0 : index
    %c0_52 = arith.constant 0 : index
    %122 = vector.load %arg16[%c0_51, %c0_52] : memref<32x32xbf16, #tpu.memory_space<vmem>>, vector<32x32xbf16>
    %cst_53 = arith.constant dense<0.000000e+00> : vector<16x32xf32>
    %123 = tpu.matmul %121, %122, %cst_53 {dimension_numbers = #tpu.dot_dimension_numbers<[1], [0], [0], [1], [0, 0, 1, 1], [], []>} : vector<16x32xbf16>, vector<32x32xbf16>, vector<16x32xf32> -> vector<16x32xf32>
    %c0_54 = arith.constant 0 : index
    %c0_55 = arith.constant 0 : index
    %124 = vector.load %arg17[%c0_54, %c0_55] : memref<1x32xf32, #tpu.memory_space<vmem>>, vector<1x32xf32>
    %125 = vector.broadcast %124 : vector<1x32xf32> to vector<16x32xf32>
    %126 = arith.addf %123, %125 : vector<16x32xf32>
    %cst_56 = arith.constant 0.000000e+00 : f32
    %127 = vector.broadcast %cst_56 : f32 to vector<16x32xf32>
    %128 = arith.maximumf %126, %127 : vector<16x32xf32>
    %129 = arith.truncf %128 : vector<16x32xf32> to vector<16x32xbf16>
    %c0_57 = arith.constant 0 : index
    %c0_58 = arith.constant 0 : index
    %130 = vector.load %arg18[%c0_57, %c0_58] : memref<32x32xbf16, #tpu.memory_space<vmem>>, vector<32x32xbf16>
    %cst_59 = arith.constant dense<0.000000e+00> : vector<16x32xf32>
    %131 = tpu.matmul %129, %130, %cst_59 {dimension_numbers = #tpu.dot_dimension_numbers<[1], [0], [0], [1], [0, 0, 1, 1], [], []>} : vector<16x32xbf16>, vector<32x32xbf16>, vector<16x32xf32> -> vector<16x32xf32>
    %c0_60 = arith.constant 0 : index
    %c0_61 = arith.constant 0 : index
    %132 = vector.load %arg19[%c0_60, %c0_61] : memref<1x32xf32, #tpu.memory_space<vmem>>, vector<1x32xf32>
    %133 = vector.broadcast %132 : vector<1x32xf32> to vector<16x32xf32>
    %134 = arith.addf %131, %133 : vector<16x32xf32>
    %135 = arith.negf %134 : vector<16x32xf32>
    %136 = math.exp %135 : vector<16x32xf32>
    %cst_62 = arith.constant 1.000000e+00 : f32
    %137 = vector.broadcast %cst_62 : f32 to vector<16x32xf32>
    %138 = arith.addf %137, %136 : vector<16x32xf32>
    %139 = arith.divf %137, %138 : vector<16x32xf32>
    %cst_63 = arith.constant 9.900000e+01 : f32
    %140 = vector.broadcast %cst_63 : f32 to vector<16x32xf32>
    %141 = arith.mulf %140, %139 : vector<16x32xf32>
    %cst_64 = arith.constant 1.000000e+00 : f32
    %142 = vector.broadcast %cst_64 : f32 to vector<16x32xf32>
    %143 = arith.addf %142, %141 : vector<16x32xf32>
    %c0_65 = arith.constant 0 : index
    %c0_66 = arith.constant 0 : index
    %144 = vector.load %arg20[%c0_65, %c0_66] : memref<16x1xf32, #tpu.memory_space<vmem>>, vector<16x1xf32>
    %145 = tpu.reciprocal %143 {approx = true} : vector<16x32xf32> -> vector<16x32xf32>
    %146 = vector.broadcast %144 : vector<16x1xf32> to vector<16x32xf32>
    %147 = arith.mulf %146, %145 : vector<16x32xf32>
    %148 = arith.subf %101, %43 : vector<16x32xf32>
    %149 = arith.mulf %148, %147 : vector<16x32xf32>
    %150 = arith.addf %43, %149 : vector<16x32xf32>
    %c0_67 = arith.constant 0 : index
    %c0_68 = arith.constant 0 : index
    %151 = vector.load %arg21[%c0_67, %c0_68] : memref<16x32xf32, #tpu.memory_space<vmem>>, vector<16x32xf32>
    tpu.vector_store %arg21[%c0_67, %c0_68], %150 {strides = array<i32>} : memref<16x32xf32, #tpu.memory_space<vmem>>, vector<16x32xf32>,
    return
  }
  func.func @transform_0(%arg0: i32) -> (i32, i32) {
    %c0_i32 = arith.constant 0 : i32
    %c0_i32_0 = arith.constant 0 : i32
    return %arg0, %c0_i32 : i32, i32
  }
  func.func @transform_1(%arg0: i32) -> (i32, i32) {
    %c0_i32 = arith.constant 0 : i32
    %c0_i32_0 = arith.constant 0 : i32
    return %arg0, %c0_i32 : i32, i32
  }
  func.func @transform_2(%arg0: i32) -> (i32, i32) {
    %c0_i32 = arith.constant 0 : i32
    %c0_i32_0 = arith.constant 0 : i32
    %c0_i32_1 = arith.constant 0 : i32
    return %c0_i32, %c0_i32_0 : i32, i32
  }
  func.func @transform_3(%arg0: i32) -> (i32, i32) {
    %c0_i32 = arith.constant 0 : i32
    %c0_i32_0 = arith.constant 0 : i32
    %c0_i32_1 = arith.constant 0 : i32
    return %c0_i32, %c0_i32_0 : i32, i32
  }
  func.func @transform_4(%arg0: i32) -> (i32, i32) {
    %c0_i32 = arith.constant 0 : i32
    %c0_i32_0 = arith.constant 0 : i32
    %c0_i32_1 = arith.constant 0 : i32
    return %c0_i32, %c0_i32_0 : i32, i32
  }
  func.func @transform_5(%arg0: i32) -> (i32, i32) {
    %c0_i32 = arith.constant 0 : i32
    %c0_i32_0 = arith.constant 0 : i32
    %c0_i32_1 = arith.constant 0 : i32
    return %c0_i32, %c0_i32_0 : i32, i32
  }
  func.func @transform_6(%arg0: i32) -> (i32, i32) {
    %c0_i32 = arith.constant 0 : i32
    %c0_i32_0 = arith.constant 0 : i32
    %c0_i32_1 = arith.constant 0 : i32
    return %c0_i32, %c0_i32_0 : i32, i32
  }
  func.func @transform_7(%arg0: i32) -> (i32, i32) {
    %c0_i32 = arith.constant 0 : i32
    %c0_i32_0 = arith.constant 0 : i32
    %c0_i32_1 = arith.constant 0 : i32
    return %c0_i32, %c0_i32_0 : i32, i32
  }
  func.func @transform_8(%arg0: i32) -> (i32, i32) {
    %c0_i32 = arith.constant 0 : i32
    %c0_i32_0 = arith.constant 0 : i32
    %c0_i32_1 = arith.constant 0 : i32
    return %c0_i32, %c0_i32_0 : i32, i32
  }
  func.func @transform_9(%arg0: i32) -> (i32, i32) {
    %c0_i32 = arith.constant 0 : i32
    %c0_i32_0 = arith.constant 0 : i32
    %c0_i32_1 = arith.constant 0 : i32
    return %c0_i32, %c0_i32_0 : i32, i32
  }
  func.func @transform_10(%arg0: i32) -> (i32, i32) {
    %c0_i32 = arith.constant 0 : i32
    %c0_i32_0 = arith.constant 0 : i32
    %c0_i32_1 = arith.constant 0 : i32
    return %c0_i32, %c0_i32_0 : i32, i32
  }
  func.func @transform_11(%arg0: i32) -> (i32, i32) {
    %c0_i32 = arith.constant 0 : i32
    %c0_i32_0 = arith.constant 0 : i32
    %c0_i32_1 = arith.constant 0 : i32
    return %c0_i32, %c0_i32_0 : i32, i32
  }
  func.func @transform_12(%arg0: i32) -> (i32, i32) {
    %c0_i32 = arith.constant 0 : i32
    %c0_i32_0 = arith.constant 0 : i32
    %c0_i32_1 = arith.constant 0 : i32
    return %c0_i32, %c0_i32_0 : i32, i32
  }
  func.func @transform_13(%arg0: i32) -> (i32, i32) {
    %c0_i32 = arith.constant 0 : i32
    %c0_i32_0 = arith.constant 0 : i32
    %c0_i32_1 = arith.constant 0 : i32
    return %c0_i32, %c0_i32_0 : i32, i32
  }
  func.func @transform_14(%arg0: i32) -> (i32, i32) {
    %c0_i32 = arith.constant 0 : i32
    %c0_i32_0 = arith.constant 0 : i32
    %c0_i32_1 = arith.constant 0 : i32
    return %c0_i32, %c0_i32_0 : i32, i32
  }
  func.func @transform_15(%arg0: i32) -> (i32, i32) {
    %c0_i32 = arith.constant 0 : i32
    %c0_i32_0 = arith.constant 0 : i32
    %c0_i32_1 = arith.constant 0 : i32
    return %c0_i32, %c0_i32_0 : i32, i32
  }
  func.func @transform_16(%arg0: i32) -> (i32, i32) {
    %c0_i32 = arith.constant 0 : i32
    %c0_i32_0 = arith.constant 0 : i32
    %c0_i32_1 = arith.constant 0 : i32
    return %c0_i32, %c0_i32_0 : i32, i32
  }
  func.func @transform_17(%arg0: i32) -> (i32, i32) {
    %c0_i32 = arith.constant 0 : i32
    %c0_i32_0 = arith.constant 0 : i32
    %c0_i32_1 = arith.constant 0 : i32
    return %c0_i32, %c0_i32_0 : i32, i32
  }
  func.func @transform_18(%arg0: i32) -> (i32, i32) {
    %c0_i32 = arith.constant 0 : i32
    %c0_i32_0 = arith.constant 0 : i32
    %c0_i32_1 = arith.constant 0 : i32
    return %c0_i32, %c0_i32_0 : i32, i32
  }
  func.func @transform_19(%arg0: i32) -> (i32, i32) {
    %c0_i32 = arith.constant 0 : i32
    %c0_i32_0 = arith.constant 0 : i32
    return %arg0, %c0_i32 : i32, i32
  }
  func.func @transform_20(%arg0: i32) -> (i32, i32) {
    %c0_i32 = arith.constant 0 : i32
    %c0_i32_0 = arith.constant 0 : i32
    return %arg0, %c0_i32 : i32, i32
  }
}

</mosaic_0001>

<bundles_post_ra>
// kernel: tpu_custom_call.1
= control target key start
LH: loop header
LB: loop body
LE: loop exit
PB: predicated region body
PF: predicated region fallthrough
CT: control target
= control target key end

     0   :  { %s1669_s0 = inlined_call_operand.vmem [shape: f32[16,32], index: 0, kind: input, shape index: {}]   ;;  %s1670_s1 = inlined_call_operand.hbm [shape: f32[16,32], index: 1, kind: input, shape index: {}]   ;;  %s1671_s2 = inlined_call_operand.hbm [shape: f32[1,32], index: 2, kind: input, shape index: {}]   ;;  %s1672_s3 = inlined_call_operand.hbm [shape: f32[1,32], index: 3, kind: input, shape index: {}]   ;;  %s1673_s4 = inlined_call_operand.hbm [shape: f32[1,32], index: 4, kind: input, shape index: {}]   ;;  %s1674_s5 = inlined_call_operand.hbm [shape: f32[1,32], index: 5, kind: input, shape index: {}]   ;;  %s1675_s6 = inlined_call_operand.hbm [shape: f32[1,32], index: 6, kind: input, shape index: {}]   ;;  %s1676_s7 = inlined_call_operand.hbm [shape: f32[1,32], index: 7, kind: input, shape index: {}]   ;;  %s1677_s8 = inlined_call_operand.hbm [shape: bf16[32,32], index: 8, kind: input, shape index: {}]   ;;  %s1678_s9 = inlined_call_operand.vmem [shape: bf16[32,32], index: 9, kind: input, shape index: {}]   ;;  %s1679_s10 = inlined_call_operand.hbm [shape: f32[1,32], index: 10, kind: input, shape index: {}]   ;;  %s1680_s11 = inlined_call_operand.hbm [shape: bf16[32,32], index: 11, kind: input, shape index: {}]   ;;  %s1681_s12 = inlined_call_operand.hbm [shape: f32[1,32], index: 12, kind: input, shape index: {}]   ;;  %s1682_s13 = inlined_call_operand.hbm [shape: f32[1,32], index: 13, kind: input, shape index: {}]   ;;  %s1683_s14 = inlined_call_operand.hbm [shape: f32[1,32], index: 14, kind: input, shape index: {}]   ;;  %s1684_s15 = inlined_call_operand.hbm [shape: bf16[32,32], index: 15, kind: input, shape index: {}]   ;;  %s1685_s16 = inlined_call_operand.hbm [shape: f32[1,32], index: 16, kind: input, shape index: {}]   ;;  %s1686_s17 = inlined_call_operand.vmem [shape: bf16[32,32], index: 17, kind: input, shape index: {}]   ;;  %s1687_s18 = inlined_call_operand.hbm [shape: f32[1,32], index: 18, kind: input, shape index: {}]   ;;  %s1688_s19 = inlined_call_operand.vmem [shape: f32[16,1], index: 19, kind: input, shape index: {}]   ;;  %s1689_s20 = inlined_call_operand.hbm [shape: f32[16,32], index: 20, kind: output, shape index: {}]  }
   0x1   :  { %1691 = sst [smem:[#allocation39_spill]] %s1669_s0 }
   0x2   :  { %1692 = sst [smem:[#allocation40_spill]] %s1670_s1 }
   0x3   :  { %1693 = sst [smem:[#allocation41_spill]] %s1671_s2 }
   0x4   :  { %1694 = sst [smem:[#allocation42_spill]] %s1672_s3 }
   0x5   :  { %1695 = sst [smem:[#allocation43_spill]] %s1673_s4 }
   0x6   :  { %25 = vsyncpa [#allocation3], 0 }
   0x7   :  { %26 = vsyncpa [#allocation6], 0 }
   0x8   :  { %27 = vsyncpa [#allocation9], 0 }
   0x9   :  { %28 = vsyncpa [#allocation12], 0 }
   0xa   :  { %29 = vsyncpa [#allocation15], 0 }
   0xb   :  { %30 = vsyncpa [#allocation18], 0 }
   0xc   :  { %31 = vsyncpa [#allocation21], 0 }
   0xd   :  { %32 = vsyncpa [#allocation24], 0 }
   0xe   :  { %33 = vsyncpa [#allocation27], 0 }
   0xf   :  { %34 = vsyncpa [#allocation4], 0  ;;  %s1377_s1 = smov [#allocation5]   ;;  %s1378_s23 = smov [#allocation8]  }
  0x10   :  { %s55_s22 = sshll.u32 %s1377_s1, 4  ;;  %s75_s24 = sshll.u32 %s1378_s23, 4  ;;  %s56_s22 = int_to_ptr.vmem [resolvable:$true] %s55_s22  ;;  %s76_s24 = int_to_ptr.vmem [resolvable:$true] %s75_s24 }
  0x11   :  { %s1025_s2 = scalar_lea.vmem %s56_s22, 16  ;;  %s1029_s25 = scalar_lea.vmem %s56_s22, 32 }
  0x12   :  { %p1026_p0 = scmp.ne.s32.totalorder %s56_s22, %s1025_s2  ;;  %p1030_p1 = scmp.lt.s32.totalorder %s56_s22, %s56_s22 }
  0x13   :  { %p1031_p2 = scmp.lt.s32.totalorder %s1029_s25, %s1025_s2 }
  0x15   :  { %p1032_p3 = por %p1031_p2, %p1030_p1 }
  0x17   :  { %p1033_p4 = pnand %p1032_p3, %p1026_p0 }
  0x19   :  { %1036 = shalt.err (!%p1033_p4)
}
  0x1a   :  { %s1696_s27 = sld [smem:[#allocation41_spill]]  ;;  %s1045_s28 = scalar_lea.vmem %s76_s24, 16 }
  0x1b   :  { %p1046_p5 = scmp.ne.s32.totalorder %s76_s24, %s1045_s28  ;;  %s1049_s4 = scalar_lea.vmem %s76_s24, 32 }
  0x1c   :  { %p1050_p6 = scmp.lt.s32.totalorder %s76_s24, %s76_s24  ;;  %p1051_p7 = scmp.lt.s32.totalorder %s1049_s4, %s1045_s28 }
  0x1e   :  { %p1052_p8 = por %p1051_p7, %p1050_p6 }
  0x20   :  { %58 = dma.hbm_to_vmem [thread:$0]  %s1696_s27, 16, %s56_s22, [#allocation6]  }
  0x21   :  { %p1053_p9 = pnand %p1052_p8, %p1046_p5 }
  0x23   :  { %1056 = shalt.err (!%p1053_p9)
}
  0x24   :  { %s1697_s0 = sld [smem:[#allocation43_spill]]  ;;  %s1379_s21 = smov [#allocation11]  }
  0x25   :  { %s95_s1 = sshll.u32 %s1379_s21, 4  ;;  %s1380_s23 = smov [#allocation14]   ;;  %s96_s1 = int_to_ptr.vmem [resolvable:$true] %s95_s1 }
  0x26   :  { %s114_s2 = sshll.u32 %s1380_s23, 4  ;;  %s1065_s25 = scalar_lea.vmem %s96_s1, 16  ;;  %s115_s2 = int_to_ptr.vmem [resolvable:$true] %s114_s2 }
  0x27   :  { %p1066_p10 = scmp.ne.s32.totalorder %s96_s1, %s1065_s25  ;;  %s1069_s22 = scalar_lea.vmem %s96_s1, 32 }
  0x28   :  { %p1070_p11 = scmp.lt.s32.totalorder %s96_s1, %s96_s1  ;;  %p1071_p12 = scmp.lt.s32.totalorder %s1069_s22, %s1065_s25 }
  0x2a   :  { %78 = dma.hbm_to_vmem [thread:$0]  %s1697_s0, 16, %s76_s24, [#allocation9]  }
  0x2b   :  { %p1072_p13 = por %p1071_p12, %p1070_p11 }
  0x2d   :  { %p1073_p0 = pnand %p1072_p13, %p1066_p10 }
  0x2f   :  { %1076 = shalt.err (!%p1073_p0)
}
  0x30   :  { %98 = dma.hbm_to_vmem [thread:$0]  %s1675_s6, 16, %s96_s1, [#allocation12]  }
  0x31   :  { %s1085_s27 = scalar_lea.vmem %s115_s2, 256  ;;  %p1090_p2 = scmp.lt.s32.totalorder %s115_s2, %s115_s2 }
  0x32   :  { %p1086_p1 = scmp.ne.s32.totalorder %s115_s2, %s1085_s27  ;;  %p1091_p3 = scmp.lt.s32.totalorder %s1085_s27, %s1085_s27 }
  0x34   :  { %p1092_p4 = por %p1091_p3, %p1090_p2 }
  0x36   :  { %p1093_p5 = pnand %p1092_p4, %p1086_p1 }
  0x38   :  { %1096 = shalt.err (!%p1093_p5)
}
  0x39   :  { %s1381_s24 = smov 64   ;;  %s1382_s28 = smov 4  }
  0x3a   :  { %120 = dma.hbm_to_vmem [thread:$0]  %s1677_s8, 256, %s115_s2, [#allocation15], %s1381_s24, %s1381_s24, %s1382_s28  }
  0x3b   :  { %s1383_s30 = smov [#allocation17]   ;;  %s1384_s21 = smov [#allocation20]  }
  0x3c   :  { %s138_s0 = sshll.u32 %s1383_s30, 4  ;;  %s161_s6 = sshll.u32 %s1384_s21, 4  ;;  %s139_s0 = int_to_ptr.vmem [resolvable:$true] %s138_s0  ;;  %s162_s6 = int_to_ptr.vmem [resolvable:$true] %s161_s6 }
  0x3d   :  { %s1105_s1 = scalar_lea.vmem %s139_s0, 256  ;;  %p1110_p7 = scmp.lt.s32.totalorder %s139_s0, %s139_s0 }
  0x3e   :  { %p1106_p6 = scmp.ne.s32.totalorder %s139_s0, %s1105_s1  ;;  %p1111_p8 = scmp.lt.s32.totalorder %s1105_s1, %s1105_s1 }
  0x40   :  { %p1112_p9 = por %p1111_p8, %p1110_p7 }
  0x42   :  { %p1113_p10 = pnand %p1112_p9, %p1106_p6 }
  0x44   :  { %1116 = shalt.err (!%p1113_p10)
}
  0x45   :  { %144 = dma.hbm_to_vmem [thread:$0]  %s1680_s11, 256, %s139_s0, [#allocation18], %s1381_s24, %s1381_s24, %s1382_s28  }
  0x46   :  { %s1125_s8 = scalar_lea.vmem %s162_s6, 16  ;;  %s1129_s2 = scalar_lea.vmem %s162_s6, 32 }
  0x47   :  { %p1126_p11 = scmp.ne.s32.totalorder %s162_s6, %s1125_s8  ;;  %p1130_p12 = scmp.lt.s32.totalorder %s162_s6, %s162_s6 }
  0x48   :  { %p1131_p13 = scmp.lt.s32.totalorder %s1129_s2, %s1125_s8 }
  0x4a   :  { %p1132_p0 = por %p1131_p13, %p1130_p12 }
  0x4c   :  { %p1133_p1 = pnand %p1132_p0, %p1126_p11 }
  0x4e   :  { %1136 = shalt.err (!%p1133_p1)
}
  0x4f   :  { %164 = dma.hbm_to_vmem [thread:$0]  %s1682_s13, 16, %s162_s6, [#allocation21]  }
  0x50   :  { %s1385_s26 = smov [#allocation23]   ;;  %s1386_s4 = smov [#allocation2]  }
  0x51   :  { %s180_s27 = sshll.u32 %s1385_s26, 4  ;;  %s42_s29 = sshll.u32 %s1386_s4, 4  ;;  %s181_s27 = int_to_ptr.vmem [resolvable:$true] %s180_s27  ;;  %s43_s29 = int_to_ptr.vmem [resolvable:$true] %s42_s29 }
  0x52   :  { %s1145_s30 = scalar_lea.vmem %s181_s27, 256  ;;  %p1150_p3 = scmp.lt.s32.totalorder %s181_s27, %s181_s27 }
  0x53   :  { %p1146_p2 = scmp.ne.s32.totalorder %s181_s27, %s1145_s30  ;;  %p1151_p4 = scmp.lt.s32.totalorder %s1145_s30, %s1145_s30 }
  0x55   :  { %p1152_p5 = por %p1151_p4, %p1150_p3 }
  0x57   :  { %p1153_p6 = pnand %p1152_p5, %p1146_p2 }
  0x59   :  { %1156 = shalt.err (!%p1153_p6)
}
  0x5a   :  { %186 = dma.hbm_to_vmem [thread:$0]  %s1684_s15, 256, %s181_s27, [#allocation24], %s1381_s24, %s1381_s24, %s1382_s28  }
  0x5b   :  { %s1165_s13 = scalar_lea.vmem %s43_s29, 256  ;;  %p1170_p8 = scmp.lt.s32.totalorder %s43_s29, %s43_s29 }
  0x5c   :  { %p1166_p7 = scmp.ne.s32.totalorder %s43_s29, %s1165_s13  ;;  %p1171_p9 = scmp.lt.s32.totalorder %s1165_s13, %s1165_s13 }
  0x5e   :  { %p1172_p10 = por %p1171_p9, %p1170_p8 }
  0x60   :  { %p1173_p11 = pnand %p1172_p10, %p1166_p7 }
  0x62   :  { %1176 = shalt.err (!%p1173_p11)
}
  0x63   :  { %s1387_s21 = smov 128   ;;  %s1388_s6 = smov 8  }
  0x64   :  { %s1698_s25 = sld [smem:[#allocation40_spill]]  ;;  %s1389_s8 = smov [#allocation7]  }
  0x65   :  { %s65_s2 = sshll.u32 %s1389_s8, 4  ;;  %s1390_s22 = smov [#allocation10]   ;;  %s66_s2 = int_to_ptr.vmem [resolvable:$true] %s65_s2 }
  0x66   :  { %s85_s15 = sshll.u32 %s1390_s22, 4  ;;  %s1185_s24 = scalar_lea.vmem %s66_s2, 16  ;;  %s86_s15 = int_to_ptr.vmem [resolvable:$true] %s85_s15 }
  0x67   :  { %p1186_p12 = scmp.ne.s32.totalorder %s66_s2, %s1185_s24  ;;  %s1189_s28 = scalar_lea.vmem %s66_s2, 32 }
  0x68   :  { %p1190_p13 = scmp.lt.s32.totalorder %s66_s2, %s66_s2  ;;  %p1191_p0 = scmp.lt.s32.totalorder %s1189_s28, %s1185_s24 }
  0x6a   :  { %48 = dma.hbm_to_vmem [thread:$0]  %s1698_s25, 256, %s43_s29, [#allocation3], %s1387_s21, %s1387_s21, %s1388_s6  }
  0x6b   :  { %p1192_p1 = por %p1191_p0, %p1190_p13 }
  0x6d   :  { %p1193_p2 = pnand %p1192_p1, %p1186_p12 }
  0x6f   :  { %1196 = shalt.err (!%p1193_p2)
}
  0x70   :  { %s1699_s27 = sld [smem:[#allocation42_spill]]  ;;  %s1205_s4 = scalar_lea.vmem %s86_s15, 16 }
  0x71   :  { %p1206_p3 = scmp.ne.s32.totalorder %s86_s15, %s1205_s4  ;;  %s1209_s29 = scalar_lea.vmem %s86_s15, 32 }
  0x72   :  { %p1210_p4 = scmp.lt.s32.totalorder %s86_s15, %s86_s15  ;;  %p1211_p5 = scmp.lt.s32.totalorder %s1209_s29, %s1205_s4 }
  0x74   :  { %p1212_p6 = por %p1211_p5, %p1210_p4 }
  0x76   :  { %68 = dma.hbm_to_vmem [thread:$0]  %s1699_s27, 16, %s66_s2, [#allocation6]  }
  0x77   :  { %p1213_p7 = pnand %p1212_p6, %p1206_p3 }
  0x79   :  { %1216 = shalt.err (!%p1213_p7)
}
  0x7a   :  { %88 = dma.hbm_to_vmem [thread:$0]  %s1674_s5, 16, %s86_s15, [#allocation9]  }
  0x7b   :  { %s1391_s0 = smov [#allocation13]   ;;  %s1392_s1 = smov [#allocation16]  }
  0x7c   :  { %s105_s13 = sshll.u32 %s1391_s0, 4  ;;  %s129_s23 = sshll.u32 %s1392_s1, 4  ;;  %s106_s13 = int_to_ptr.vmem [resolvable:$true] %s105_s13  ;;  %s130_s23 = int_to_ptr.vmem [resolvable:$true] %s129_s23 }
  0x7d   :  { %s1225_s25 = scalar_lea.vmem %s106_s13, 16  ;;  %s1229_s8 = scalar_lea.vmem %s106_s13, 32 }
  0x7e   :  { %p1226_p8 = scmp.ne.s32.totalorder %s106_s13, %s1225_s25  ;;  %p1230_p9 = scmp.lt.s32.totalorder %s106_s13, %s106_s13 }
  0x7f   :  { %p1231_p10 = scmp.lt.s32.totalorder %s1229_s8, %s1225_s25 }
  0x81   :  { %p1232_p11 = por %p1231_p10, %p1230_p9 }
  0x83   :  { %p1233_p12 = pnand %p1232_p11, %p1226_p8 }
  0x85   :  { %1236 = shalt.err (!%p1233_p12)
}
  0x86   :  { %108 = dma.hbm_to_vmem [thread:$0]  %s1676_s7, 16, %s106_s13, [#allocation12]  }
  0x87   :  { %s1245_s24 = scalar_lea.vmem %s130_s23, 16  ;;  %s1249_s5 = scalar_lea.vmem %s130_s23, 32 }
  0x88   :  { %p1246_p13 = scmp.ne.s32.totalorder %s130_s23, %s1245_s24  ;;  %p1250_p0 = scmp.lt.s32.totalorder %s130_s23, %s130_s23 }
  0x89   :  { %p1251_p1 = scmp.lt.s32.totalorder %s1249_s5, %s1245_s24 }
  0x8b   :  { %p1252_p2 = por %p1251_p1, %p1250_p0 }
  0x8d   :  { %p1253_p3 = pnand %p1252_p2, %p1246_p13 }
  0x8f   :  { %1256 = shalt.err (!%p1253_p3)
}
  0x90   :  { %132 = dma.hbm_to_vmem [thread:$0]  %s1679_s10, 16, %s130_s23, [#allocation15]  }
  0x91   :  { %s1393_s3 = smov [#allocation19]   ;;  %s1394_s27 = smov [#allocation22]  }
  0x92   :  { %s151_s26 = sshll.u32 %s1393_s3, 4  ;;  %s171_s4 = sshll.u32 %s1394_s27, 4  ;;  %s152_s26 = int_to_ptr.vmem [resolvable:$true] %s151_s26  ;;  %s172_s4 = int_to_ptr.vmem [resolvable:$true] %s171_s4 }
  0x93   :  { %s1265_s29 = scalar_lea.vmem %s152_s26, 16  ;;  %s1269_s7 = scalar_lea.vmem %s152_s26, 32 }
  0x94   :  { %p1266_p4 = scmp.ne.s32.totalorder %s152_s26, %s1265_s29  ;;  %p1270_p5 = scmp.lt.s32.totalorder %s152_s26, %s152_s26 }
  0x95   :  { %p1271_p6 = scmp.lt.s32.totalorder %s1269_s7, %s1265_s29 }
  0x97   :  { %p1272_p7 = por %p1271_p6, %p1270_p5 }
  0x99   :  { %p1273_p8 = pnand %p1272_p7, %p1266_p4 }
  0x9b   :  { %1276 = shalt.err (!%p1273_p8)
}
  0x9c   :  { %154 = dma.hbm_to_vmem [thread:$0]  %s1681_s12, 16, %s152_s26, [#allocation18]  }
  0x9d   :  { %s1285_s0 = scalar_lea.vmem %s172_s4, 16  ;;  %s1289_s10 = scalar_lea.vmem %s172_s4, 32 }
  0x9e   :  { %p1286_p9 = scmp.ne.s32.totalorder %s172_s4, %s1285_s0  ;;  %p1290_p10 = scmp.lt.s32.totalorder %s172_s4, %s172_s4 }
  0x9f   :  { %p1291_p11 = scmp.lt.s32.totalorder %s1289_s10, %s1285_s0 }
  0xa1   :  { %p1292_p12 = por %p1291_p11, %p1290_p10 }
  0xa3   :  { %p1293_p13 = pnand %p1292_p12, %p1286_p9 }
  0xa5   :  { %1296 = shalt.err (!%p1293_p13)
}
  0xa6   :  { %174 = dma.hbm_to_vmem [thread:$0]  %s1683_s14, 16, %s172_s4, [#allocation21]  }
  0xa7   :  { %s1395_s23 = smov [#allocation25]   ;;  %s1396_s8 = smov [#allocation26]  }
  0xa8   :  { %s193_s25 = sshll.u32 %s1395_s23, 4  ;;  %s205_s2 = sshll.u32 %s1396_s8, 4  ;;  %s194_s25 = int_to_ptr.vmem [resolvable:$true] %s193_s25  ;;  %s206_s2 = int_to_ptr.vmem [resolvable:$true] %s205_s2 }
  0xa9   :  { %s1305_s22 = scalar_lea.vmem %s194_s25, 16  ;;  %s1309_s12 = scalar_lea.vmem %s194_s25, 32 }
  0xaa   :  { %p1306_p0 = scmp.ne.s32.totalorder %s194_s25, %s1305_s22  ;;  %p1310_p1 = scmp.lt.s32.totalorder %s194_s25, %s194_s25 }
  0xab   :  { %p1311_p2 = scmp.lt.s32.totalorder %s1309_s12, %s1305_s22 }
  0xad   :  { %p1312_p3 = por %p1311_p2, %p1310_p1 }
  0xaf   :  { %p1313_p4 = pnand %p1312_p3, %p1306_p0 }
  0xb1   :  { %1316 = shalt.err (!%p1313_p4)
}
  0xb2   :  { %196 = dma.hbm_to_vmem [thread:$0]  %s1685_s16, 16, %s194_s25, [#allocation24]  }
  0xb3   :  { %s1325_s15 = scalar_lea.vmem %s206_s2, 16  ;;  %s1329_s14 = scalar_lea.vmem %s206_s2, 32 }
  0xb4   :  { %p1326_p5 = scmp.ne.s32.totalorder %s206_s2, %s1325_s15  ;;  %p1330_p6 = scmp.lt.s32.totalorder %s206_s2, %s206_s2 }
  0xb5   :  { %p1331_p7 = scmp.lt.s32.totalorder %s1329_s14, %s1325_s15 }
  0xb7   :  { %p1332_p8 = por %p1331_p7, %p1330_p6 }
  0xb9   :  { %p1333_p9 = pnand %p1332_p8, %p1326_p5 }
  0xbb   :  { %1336 = shalt.err (!%p1333_p9)
}
  0xbc   :  { %208 = dma.hbm_to_vmem [thread:$0]  %s1687_s18, 16, %s206_s2, [#allocation27]  }
  0xbd   :  { %1357 = dma.done.wait [#allocation3], 256  }
  0xbe   :  { %1358 = vsyncadd [#allocation3], 4294967040 }
  0xbf   :  { %1359 = dma.done.wait [#allocation6], 32  }
  0xc0   :  { %1360 = vsyncadd [#allocation6], 4294967264 }
  0xc1   :  { %1361 = dma.done.wait [#allocation9], 32  }
  0xc2   :  { %1362 = vsyncadd [#allocation9], 4294967264 }
  0xc3   :  { %1363 = dma.done.wait [#allocation12], 32  }
  0xc4   :  { %1364 = vsyncadd [#allocation12], 4294967264 }
  0xc5   :  { %1365 = dma.done.wait [#allocation15], 272  }
  0xc6   :  { %1366 = vsyncadd [#allocation15], 4294967024 }
  0xc7   :  { %1367 = dma.done.wait [#allocation18], 272  }
  0xc8   :  { %1368 = vsyncadd [#allocation18], 4294967024 }
  0xc9   :  { %1369 = dma.done.wait [#allocation21], 32  }
  0xca   :  { %1370 = vsyncadd [#allocation21], 4294967264 }
  0xcb   :  { %1371 = dma.done.wait [#allocation24], 272  }
  0xcc   :  { %1372 = vsyncadd [#allocation24], 4294967024 }
  0xcd   :  { %1373 = dma.done.wait [#allocation27], 16  }
  0xce   :  { %1374 = vsyncadd [#allocation27], 4294967280  ;;  %vm266_vm0 = vcmask 261120   ;;  %s1700_s26 = sld [smem:[#allocation39_spill]]  ;;  %v262_v1 = vld [vmem:[#allocation2] sm:$0xff]  ;;  %v263_v5 = vld [vmem:[#allocation2 + $0x8] sm:$0xff] }
  0xcf   :  { %v309_v4 = vsel %vm266_vm0, %v262_v1, 0.0  ;;  %v312_v7 = vsel %vm266_vm0, %v263_v5, 0.0  ;;  %v865_v41 = vld [vmem:[#allocation5] ss:$0 sm:$0xff]  ;;  %v866_v43 = vld [vmem:[#allocation7] ss:$0 sm:$0xff] }
  0xd0   :  { %310 = vadd.xlane.f32.xlu1 %v309_v4  ;;  %vm1398_vm1 = vmmov 0  }
  0xd4   :  { %v260_v0 = vld [vmem:[%s1700_s26] sm:$0xff]  ;;  %v261_v2 = vld [vmem:[%s1700_s26 + $0x8] sm:$0xff]  ;;  %313 = vadd.xlane.f32.xlu1 %v312_v7 }
  0xd5   :  { %v267_v3 = vsel %vm266_vm0, %v260_v0, 0.0  ;;  %v270_v6 = vsel %vm266_vm0, %v261_v2, 0.0  ;;  %v976_v7 = vld [vmem:[#allocation14 + $0x8] sm:$0xff]  }
  0xd6   :  { %268 = vadd.xlane.f32.xlu0 %v267_v3 }
  0xda   :  { %271 = vadd.xlane.f32.xlu0 %v270_v6  ;;  %v975_v6 = vld [vmem:[%s1678_s9 + $0x8] sm:$0xff]  }
 0x159   :  { %v311_v9 = vpop.xlane.xlu1 %310 }
 0x15a   :  { %v315_v11 = vmul.f32 0.03125, %v311_v9  ;;  %v977_v9 = vld [vmem:[%s1678_s9] sm:$0xff]  }
 0x15c   :  { %v317_v13 = vsub.f32 %v262_v1, %v315_v11 }
 0x15d   :  { %v314_v15 = vpop.xlane.xlu1 %313 }
 0x15e   :  { %v316_v17 = vmul.f32 0.03125, %v314_v15  ;;  %v319_v19 = vmul.f32 %v317_v13, %v317_v13 }
 0x15f   :  { %v269_v8 = vpop.xlane.xlu0 %268 }
 0x160   :  { %v273_v10 = vmul.f32 0.03125, %v269_v8  ;;  %v318_v21 = vsub.f32 %v263_v5, %v316_v17  ;;  %v321_v23 = vsel %vm266_vm0, %v319_v19, 0.0  ;;  %v1397_v8 = vmov 0.0  }
 0x161   :  { %909 = vmatprep.subr.bf16.mxu0 %v1397_v8  ;;  %917 = vmatprep.subr.bf16.mxu1 %v1397_v8 }
 0x162   :  { %v275_v12 = vsub.f32 %v260_v0, %v273_v10  ;;  %v320_v25 = vmul.f32 %v318_v21, %v318_v21  ;;  %910 = vmatpush3.bf16.msra.mxu0 %v975_v6  ;;  %918 = vmatpush3.bf16.msra.mxu1 %v976_v7  ;;  %v978_v10 = vld [vmem:[#allocation14] sm:$0xff]  }
 0x163   :  { %v272_v14 = vpop.xlane.xlu0 %271  ;;  %911 = vmatprep.subr.bf16.mxu0 %v1397_v8  ;;  %919 = vmatprep.subr.bf16.mxu1 %v1397_v8 }
 0x164   :  { %v274_v16 = vmul.f32 0.03125, %v272_v14  ;;  %v277_v18 = vmul.f32 %v275_v12, %v275_v12  ;;  %v324_v27 = vsel %vm266_vm0, %v320_v25, 0.0  ;;  %913 = vmatprep.mubr.msk.bf16.mxu0 %vm1398_vm1, %v1397_v8  ;;  %921 = vmatprep.mubr.msk.bf16.mxu1 %vm1398_vm1, %v1397_v8 }
 0x166   :  { %v276_v20 = vsub.f32 %v261_v2, %v274_v16  ;;  %v279_v22 = vsel %vm266_vm0, %v277_v18, 0.0  ;;  %912 = vmatpush3.bf16.msra.mxu0 %v977_v9  ;;  %920 = vmatpush3.bf16.msra.mxu1 %v978_v10  ;;  %v979_v10 = vld [vmem:[#allocation23 + $0x8] sm:$0xff]  }
 0x167   :  { %280 = vadd.xlane.f32.xlu0 %v279_v22  ;;  %933 = vmatprep.subr.bf16.mxu1 %v1397_v8 }
 0x168   :  { %v278_v24 = vmul.f32 %v276_v20, %v276_v20  ;;  %925 = vmatprep.subr.bf16.mxu0 %v1397_v8 }
 0x16a   :  { %v282_v26 = vsel %vm266_vm0, %v278_v24, 0.0 }
 0x16b   :  { %322 = vadd.xlane.f32.xlu0 %v321_v23  ;;  %283 = vadd.xlane.f32.xlu1 %v282_v26 }
 0x16f   :  { %325 = vadd.xlane.f32.xlu1 %v324_v27 }
 0x1f0   :  { %v281_v28 = vpop.xlane.xlu0 %280 }
 0x1f1   :  { %v285_v29 = vmul.f32 0.03125, %v281_v28 }
 0x1f3   :  { %v287_v30 = vadd.f32 1e-05, %v285_v29 }
 0x1f4   :  { %v284_v31 = vpop.xlane.xlu1 %283  ;;  %v323_v32 = vpop.xlane.xlu0 %322 }
 0x1f5   :  { %985 = vrsqrt.f32 %v287_v30  ;;  %v286_v33 = vmul.f32 0.03125, %v284_v31  ;;  %v327_v34 = vmul.f32 0.03125, %v323_v32 }
 0x1f7   :  { %v288_v35 = vadd.f32 1e-05, %v286_v33  ;;  %v329_v36 = vadd.f32 1e-05, %v327_v34 }
 0x1f8   :  { %v326_v37 = vpop.xlane.xlu1 %325 }
 0x1f9   :  { %987 = vrsqrt.f32 %v288_v35  ;;  %v328_v38 = vmul.f32 0.03125, %v326_v37 }
 0x1fa   :  { %989 = vrsqrt.f32 %v329_v36 }
 0x1fb   :  { %v330_v39 = vadd.f32 1e-05, %v328_v38 }
 0x1fd   :  { %991 = vrsqrt.f32 %v330_v39 }
 0x202   :  { %v986_v40 = vpop.eup %985 }
 0x203   :  { %v291_v42 = vmul.f32 %v986_v40, %v275_v12 }
 0x205   :  { %v299_v44 = vmul.f32 %v865_v41, %v291_v42 }
 0x206   :  { %v988_v45 = vpop.eup %987 }
 0x207   :  { %v990_v46 = vpop.eup %989  ;;  %v1580_v47 = vadd.f32 %v866_v43, %v299_v44  ;;  %v292_v48 = vmul.f32 %v988_v45, %v276_v20 }
 0x208   :  { %v333_v49 = vmul.f32 %v990_v46, %v317_v13 }
 0x209   :  { %v339_v50 = vsel %vm266_vm0, %v1580_v47, 0.0  ;;  %v300_v51 = vmul.f32 %v865_v41, %v292_v48  ;;  %v345_v60 = vmul.f32 %v1580_v47, %v1580_v47  ;;  %v869_v48 = vld [vmem:[#allocation11] ss:$0 sm:$0xff] }
 0x20a   :  { %v992_v52 = vpop.eup %991  ;;  %340 = vadd.xlane.f32.xlu0 %v339_v50  ;;  %v335_v53 = vmul.f32 %v865_v41, %v333_v49  ;;  %v867_v50 = vld [vmem:[#allocation8] ss:$0 sm:$0xff] }
 0x20b   :  { %v334_v54 = vmul.f32 %v992_v52, %v318_v21  ;;  %v1584_v55 = vadd.f32 %v866_v43, %v300_v51  ;;  %v347_v0 = vsel %vm266_vm0, %v345_v60, 0.0 }
 0x20c   :  { %v1586_v56 = vadd.f32 %v866_v43, %v335_v53 }
 0x20d   :  { %v336_v57 = vmul.f32 %v865_v41, %v334_v54  ;;  %v342_v58 = vsel %vm266_vm0, %v1584_v55, 0.0  ;;  %v346_v63 = vmul.f32 %v1584_v55, %v1584_v55 }
 0x20e   :  { %343 = vadd.xlane.f32.xlu1 %v342_v58  ;;  %v353_v59 = vsel %vm266_vm0, %v1586_v56, 0.0  ;;  %v359_v1 = vmul.f32 %v1586_v56, %v1586_v56 }
 0x20f   :  { %v1594_v61 = vadd.f32 %v866_v43, %v336_v57  ;;  %354 = vadd.xlane.f32.xlu0 %v353_v59  ;;  %v350_v2 = vsel %vm266_vm0, %v346_v63, 0.0 }
 0x210   :  { %v361_v4 = vsel %vm266_vm0, %v359_v1, 0.0  ;;  %v868_v1 = vld [vmem:[#allocation10] ss:$0 sm:$0xff] }
 0x211   :  { %v356_v62 = vsel %vm266_vm0, %v1594_v61, 0.0  ;;  %v360_v3 = vmul.f32 %v1594_v61, %v1594_v61 }
 0x212   :  { %357 = vadd.xlane.f32.xlu1 %v356_v62 }
 0x213   :  { %348 = vadd.xlane.f32.xlu0 %v347_v0  ;;  %v364_v5 = vsel %vm266_vm0, %v360_v3, 0.0  ;;  %v870_v0 = vld [vmem:[#allocation13] ss:$0 sm:$0xff] }
 0x216   :  { %351 = vadd.xlane.f32.xlu1 %v350_v2 }
 0x217   :  { %362 = vadd.xlane.f32.xlu0 %v361_v4 }
 0x21a   :  { %365 = vadd.xlane.f32.xlu1 %v364_v5 }
 0x293   :  { %v341_v11 = vpop.xlane.xlu0 %340 }
 0x297   :  { %v344_v12 = vpop.xlane.xlu1 %343 }
 0x298   :  { %v355_v13 = vpop.xlane.xlu0 %354 }
 0x299   :  { %v367_v14 = vadd.f32 %v355_v13, %v341_v11  ;;  %v628_v19 = vmul.f32 0.03125, %v355_v13  ;;  %v882_v11 = vld [vmem:[#allocation20] ss:$0 sm:$0xff] }
 0x29b   :  { %v358_v15 = vpop.xlane.xlu1 %357  ;;  %v369_v18 = vmul.f32 0.015625, %v367_v14  ;;  %v632_v26 = vmul.f32 %v628_v19, %v628_v19  ;;  %v636_v63 = vsub.f32 %v1586_v56, %v628_v19 }
 0x29c   :  { %v349_v16 = vpop.xlane.xlu0 %348  ;;  %v368_v17 = vadd.f32 %v358_v15, %v344_v12  ;;  %v629_v21 = vmul.f32 0.03125, %v358_v15 }
 0x29d   :  { %v375_v27 = vmul.f32 %v369_v18, %v369_v18  ;;  %v383_v43 = vsub.f32 %v1580_v47, %v369_v18  ;;  %v406_v44 = vsub.f32 %v1586_v56, %v369_v18 }
 0x29e   :  { %v370_v25 = vmul.f32 0.015625, %v368_v17  ;;  %v633_v30 = vmul.f32 %v629_v21, %v629_v21  ;;  %v637_v57 = vsub.f32 %v1594_v61, %v629_v21  ;;  %v883_v17 = vld [vmem:[#allocation22] ss:$0 sm:$0xff]  ;;  %v981_v21 = vld [vmem:[#allocation17 + $0x8] sm:$0xff]  }
 0x29f   :  { %v352_v20 = vpop.xlane.xlu1 %351 }
 0x2a0   :  { %v363_v22 = vpop.xlane.xlu0 %362  ;;  %v376_v35 = vmul.f32 %v370_v25, %v370_v25  ;;  %v384_v52 = vsub.f32 %v1584_v55, %v370_v25  ;;  %v407_v53 = vsub.f32 %v1594_v61, %v370_v25  ;;  %v1399_v25 = vmov 0  }
 0x2a1   :  { %v371_v23 = vadd.f32 %v363_v22, %v349_v16  ;;  %v630_v24 = vmul.f32 0.03125, %v363_v22  ;;  %v980_v16 = vld [vmem:[#allocation23] sm:$0xff]   ;;  %v982_v22 = vld [vmem:[#allocation17] sm:$0xff]   ;;  %973 = vset.pattern.permute.xlu0 %v1399_v25  ;;  %974 = vset.pattern.permute.xlu1 %v1399_v25 }
 0x2a3   :  { %v373_v28 = vmul.f32 0.015625, %v371_v23  ;;  %v366_v29 = vpop.xlane.xlu1 %365  ;;  %v634_v34 = vsub.f32 %v630_v24, %v632_v26  ;;  %v816_v23 = vld [vmem:[%s1688_s19] sm:$0xff]  ;;  %v817_v24 = vld [vmem:[%s1688_s19 + $0x8] sm:$0xff] }
 0x2a4   :  { %v372_v31 = vadd.f32 %v366_v29, %v352_v20  ;;  %v631_v32 = vmul.f32 0.03125, %v366_v29  ;;  %822 = vperm.xlu0 %973, %v816_v23   ;;  %827 = vperm.xlu1 %974, %v817_v24   ;;  %v877_v29 = vld [vmem:[#allocation16] ss:$0 sm:$0xff] }
 0x2a5   :  { %v377_v33 = vsub.f32 %v373_v28, %v375_v27  ;;  %v638_v41 = vadd.f32 1e-05, %v634_v34 }
 0x2a6   :  { %v374_v36 = vmul.f32 0.015625, %v372_v31  ;;  %v635_v37 = vsub.f32 %v631_v32, %v633_v30 }
 0x2a7   :  { %v379_v38 = vadd.f32 1e-05, %v377_v33 }
 0x2a8   :  { %v378_v39 = vsub.f32 %v374_v36, %v376_v35  ;;  %v639_v40 = vadd.f32 1e-05, %v635_v37 }
 0x2a9   :  { %993 = vrsqrt.f32 %v379_v38 }
 0x2aa   :  { %v380_v42 = vadd.f32 1e-05, %v378_v39  ;;  %995 = vrsqrt.f32 %v639_v40 }
 0x2ac   :  { %997 = vrsqrt.f32 %v380_v42 }
 0x2ad   :  { %999 = vrsqrt.f32 %v638_v41 }
 0x2b6   :  { %v994_v45 = vpop.eup %993 }
 0x2b7   :  { %v408_v46 = vmul.f32 %v994_v45, %v406_v44  ;;  %v385_v49 = vmul.f32 %v994_v45, %v383_v43  ;;  %v996_v51 = vpop.eup %995  ;;  %v884_v45 = vld [vmem:[#allocation25] ss:$0 sm:$0xff] }
 0x2b8   :  { %v643_v4 = vmul.f32 %v996_v51, %v637_v57  ;;  %v984_v51 = vld [vmem:[%s1686_s17] sm:$0xff]  }
 0x2b9   :  { %v998_v54 = vpop.eup %997  ;;  %v417_v60 = vmul.f32 %v869_v48, %v408_v46  ;;  %v394_v47 = vmul.f32 %v867_v50, %v385_v49  ;;  %v983_v46 = vld [vmem:[%s1686_s17 + $0x8] sm:$0xff]   ;;  %s1400_s17 = smov [#allocation28]  }
 0x2ba   :  { %v1000_v58 = vpop.eup %999  ;;  %v409_v59 = vmul.f32 %v998_v54, %v407_v53  ;;  %v386_v62 = vmul.f32 %v998_v54, %v384_v52  ;;  %v652_v14 = vmul.f32 %v882_v11, %v643_v4  ;;  %s845_s8 = sshll.u32 %s1400_s17, 4  ;;  %s846_s8 = int_to_ptr.vmem [resolvable:$true] %s845_s8 }
 0x2bb   :  { %v642_v5 = vmul.f32 %v1000_v58, %v636_v63  ;;  %v426_v6 = vadd.f32 %v870_v0, %v417_v60  ;;  %v403_v7 = vadd.f32 %v868_v1, %v394_v47  ;;  %s1337_s2 = scalar_lea.vmem %s846_s8, 256  ;;  %p1342_p11 = scmp.lt.s32.totalorder %s846_s8, %s846_s8 }
 0x2bc   :  { %v418_v2 = vmul.f32 %v869_v48, %v409_v59  ;;  %v395_v3 = vmul.f32 %v867_v50, %v386_v62  ;;  %v661_v18 = vadd.f32 %v883_v17, %v652_v14  ;;  %v888_v62 = vld [vmem:[#allocation26] ss:$0 sm:$0xff]  ;;  %p1338_p10 = scmp.ne.s32.totalorder %s846_s8, %s1337_s2  ;;  %p1343_p12 = scmp.lt.s32.totalorder %s1337_s2, %s1337_s2 }
 0x2bd   :  { %v651_v15 = vmul.f32 %v882_v11, %v642_v5 }
 0x2be   :  { %v427_v55 = vadd.f32 %v870_v0, %v418_v2  ;;  %v404_v9 = vadd.f32 %v868_v1, %v395_v3  ;;  %p1344_p13 = por %p1343_p12, %p1342_p11 }
 0x2bf   :  { %v660_v19 = vadd.f32 %v883_v17, %v651_v15  ;;  %v878_v15 = vld [vmem:[#allocation19] ss:$0 sm:$0xff] }
 0x2c0   :  { %v428_v12 = vpack.c.bf16 %v427_v55, %v426_v6  ;;  %v405_v13 = vpack.c.bf16 %v404_v9, %v403_v7  ;;  %p1345_p0 = pnand %p1344_p13, %p1338_p10 }
 0x2c1   :  { %v662_v20 = vpack.c.bf16 %v661_v18, %v660_v19 }
 0x2c2   :  { %914 = vmatmul.mubr.msk.bf16.vlgmr.msra.gmra.mxu0 %vm266_vm0, %v428_v12  ;;  %922 = vmatmul.mubr.msk.bf16.vlgmr.msra.gmra.mxu1 %vm266_vm0, %v405_v13 }
 0x2c3   :  { %934 = vmatpush3.bf16.msra.mxu1 %v979_v10  ;;  %937 = vmatprep.mubr.msk.bf16.mxu1 %vm1398_vm1, %v1397_v8 }
 0x2c4   :  { %935 = vmatprep.subr.bf16.mxu1 %v1397_v8  ;;  %929 = vmatprep.mubr.msk.bf16.mxu0 %vm1398_vm1, %v1397_v8 }
 0x2c5   :  { %926 = vmatpush3.bf16.msra.mxu0 %v981_v21 }
 0x2c6   :  { %927 = vmatprep.subr.bf16.mxu0 %v1397_v8 }
 0x2c7   :  { %936 = vmatpush3.bf16.msra.mxu1 %v980_v16 }
 0x2c9   :  { %928 = vmatpush3.bf16.msra.mxu0 %v982_v22 }
 0x2ca   :  { %938 = vmatmul.mubr.msk.bf16.vlgmr.msra.gmra.mxu1 %vm266_vm0, %v662_v20  ;;  %941 = vmatprep.subr.bf16.mxu0 %v1397_v8 }
 0x31f   :  { %v823_v17 = vpop.permute.xlu0 %822  ;;  %v828_v22 = vpop.permute.xlu1 %827 }
 0x382   :  { %v486_v26 = vpop.f32.mrf.mxu0  ;;  %v542_v27 = vpop.f32.mrf.mxu1 }
 0x383   :  { %v543_v28 = vadd.f32 %v542_v27, %v486_v26 }
 0x384   :  { %v915_v30 = vpop.f32.mrf.mxu0  ;;  %v923_v31 = vpop.f32.mrf.mxu1 }
 0x385   :  { %v556_v32 = vadd.f32 %v877_v29, %v543_v28 }
 0x386   :  { %v489_v33 = vpop.f32.mrf.mxu0  ;;  %v545_v34 = vpop.f32.mrf.mxu1 }
 0x387   :  { %v546_v35 = vadd.f32 %v545_v34, %v489_v33  ;;  %1001 = vtanh.f32 %v556_v32 }
 0x388   :  { %v916_v36 = vpop.f32.mrf.mxu0  ;;  %v924_v37 = vpop.f32.mrf.mxu1 }
 0x389   :  { %v557_v38 = vadd.f32 %v877_v29, %v546_v35 }
 0x38a   :  { %v723_v39 = vpop.f32.mrf.mxu1 }
 0x38b   :  { %1003 = vtanh.f32 %v557_v38  ;;  %v724_v50 = vadd.f32 %v884_v45, %v723_v39 }
 0x38c   :  { %v939_v40 = vpop.f32.mrf.mxu1 }
 0x38d   :  { %v730_v53 = vmax.f32 %v724_v50, 0.0 }
 0x38e   :  { %v726_v41 = vpop.f32.mrf.mxu1 }
 0x38f   :  { %v727_v48 = vadd.f32 %v884_v45, %v726_v41 }
 0x390   :  { %v940_v42 = vpop.f32.mrf.mxu1 }
 0x391   :  { %v731_v52 = vmax.f32 %v727_v48, 0.0 }
 0x393   :  { %v732_v54 = vpack.c.bf16 %v731_v52, %v730_v53 }
 0x394   :  { %v1002_v43 = vpop.eup %1001 }
 0x398   :  { %v1004_v44 = vpop.eup %1003 }
 0x399   :  { %v560_v49 = vpack.c.bf16 %v1004_v44, %v1002_v43 }
 0x39b   :  { %930 = vmatmul.mubr.msk.bf16.vlgmr.msra.gmra.mxu0 %vm266_vm0, %v560_v49 }
 0x39c   :  { %942 = vmatpush3.bf16.msra.mxu0 %v983_v46  ;;  %945 = vmatprep.mubr.msk.bf16.mxu0 %vm1398_vm1, %v1397_v8 }
 0x39d   :  { %943 = vmatprep.subr.bf16.mxu0 %v1397_v8 }
 0x3a0   :  { %944 = vmatpush3.bf16.msra.mxu0 %v984_v51 }
 0x3a3   :  { %946 = vmatmul.mubr.msk.bf16.vlgmr.msra.gmra.mxu0 %vm266_vm0, %v732_v54 }
 0x45b   :  { %v621_v57 = vpop.f32.mrf.mxu0 }
 0x45c   :  { %v622_v16 = vadd.f32 %v878_v15, %v621_v57 }
 0x45d   :  { %v931_v58 = vpop.f32.mrf.mxu0 }
 0x45e   :  { %v832_v19 = vsub.f32 %v622_v16, %v1586_v56 }
 0x45f   :  { %v624_v59 = vpop.f32.mrf.mxu0 }
 0x460   :  { %v625_v20 = vadd.f32 %v878_v15, %v624_v59 }
 0x461   :  { %v932_v60 = vpop.f32.mrf.mxu0 }
 0x462   :  { %v833_v25 = vsub.f32 %v625_v20, %v1594_v61 }
 0x463   :  { %v793_v47 = vpop.f32.mrf.mxu0 }
 0x464   :  { %v794_v63 = vadd.f32 %v888_v62, %v793_v47 }
 0x465   :  { %v947_v0 = vpop.f32.mrf.mxu0 }
 0x466   :  { %v892_v1 = vmul.f32 -1.442695, %v794_v63 }
 0x467   :  { %v796_v2 = vpop.f32.mrf.mxu0 }
 0x468   :  { %1005 = vpow2.f32 %v892_v1  ;;  %v797_v3 = vadd.f32 %v888_v62, %v796_v2 }
 0x469   :  { %v948_v4 = vpop.f32.mrf.mxu0 }
 0x46a   :  { %v893_v5 = vmul.f32 -1.442695, %v797_v3 }
 0x46c   :  { %1007 = vpow2.f32 %v893_v5 }
 0x475   :  { %v1006_v8 = vpop.eup %1005 }
 0x476   :  { %v806_v6 = vadd.f32 1.0, %v1006_v8 }
 0x478   :  { %1009 = vrcp.f32 %v806_v6 }
 0x479   :  { %v1008_v55 = vpop.eup %1007 }
 0x47a   :  { %v807_v7 = vadd.f32 1.0, %v1008_v55 }
 0x47c   :  { %1011 = vrcp.f32 %v807_v7 }
 0x485   :  { %v1010_v9 = vpop.eup %1009 }
 0x486   :  { %v812_v10 = vmul.f32 99.0, %v1010_v9 }
 0x488   :  { %v814_v11 = vadd.f32 1.0, %v812_v10 }
 0x489   :  { %v1012_v12 = vpop.eup %1011 }
 0x48a   :  { %1013 = vrcp.f32 %v814_v11  ;;  %v813_v13 = vmul.f32 99.0, %v1012_v12 }
 0x48c   :  { %v815_v14 = vadd.f32 1.0, %v813_v13 }
 0x48e   :  { %1015 = vrcp.f32 %v815_v14 }
 0x497   :  { %v1014_v18 = vpop.eup %1013 }
 0x498   :  { %v830_v21 = vmul.f32 %v1014_v18, %v823_v17 }
 0x49a   :  { %v834_v23 = vmul.f32 %v832_v19, %v830_v21 }
 0x49b   :  { %v1016_v24 = vpop.eup %1015 }
 0x49c   :  { %v836_v26 = vadd.f32 %v834_v23, %v1586_v56  ;;  %v831_v27 = vmul.f32 %v1016_v24, %v828_v22 }
 0x49e   :  { %838 = vst.msk [vmem:[#allocation28] sm:$0xff] %vm266_vm0, %v836_v26  ;;  %v835_v28 = vmul.f32 %v833_v25, %v831_v27 }
 0x4a0   :  { %v837_v29 = vadd.f32 %v835_v28, %v1594_v61 }
 0x4a2   :  { %839 = vst.msk [vmem:[#allocation28 + $0x8] sm:$0xff] %vm266_vm0, %v837_v29 }
 0x4a3   :  { %1348 = shalt.err (!%p1345_p0)
}
 0x4a4   :  { %851 = dma.vmem_to_hbm [thread:$0]  %s846_s8, 256, %s1689_s20, [#allocation4], %s1387_s21, %s1387_s21, %s1388_s6  }
 0x4a5   :  { %1375 = dma.done.wait [#allocation4], 256  }
 0x4a6   :  { %1376 = vsyncadd [#allocation4], 4294967040 }
 0x4a7   :  { %855 = vsyncpa [#allocation3], 1 }
 0x4a8   :  { %856 = vsyncpa [#allocation6], 1 }
 0x4a9   :  { %857 = vsyncpa [#allocation9], 1 }
 0x4aa   :  { %858 = vsyncpa [#allocation12], 1 }
 0x4ab   :  { %859 = vsyncpa [#allocation15], 1 }
 0x4ac   :  { %860 = vsyncpa [#allocation18], 1 }
 0x4ad   :  { %861 = vsyncpa [#allocation21], 1 }
 0x4ae   :  { %862 = vsyncpa [#allocation24], 1 }
 0x4af   :  { %863 = vsyncpa [#allocation27], 1 }
 0x4b0   :  { %864 = vsyncpa [#allocation4], 1 }

// kernel: tpu_custom_call.1
= control target key start
LH: loop header
LB: loop body
LE: loop exit
PB: predicated region body
PF: predicated region fallthrough
CT: control target
= control target key end

     0   :  { %s1669_s0 = inlined_call_operand.vmem [shape: f32[16,32], index: 0, kind: input, shape index: {}]   ;;  %s1670_s1 = inlined_call_operand.hbm [shape: f32[16,32], index: 1, kind: input, shape index: {}]   ;;  %s1671_s2 = inlined_call_operand.hbm [shape: f32[1,32], index: 2, kind: input, shape index: {}]   ;;  %s1672_s3 = inlined_call_operand.hbm [shape: f32[1,32], index: 3, kind: input, shape index: {}]   ;;  %s1673_s4 = inlined_call_operand.hbm [shape: f32[1,32], index: 4, kind: input, shape index: {}]   ;;  %s1674_s5 = inlined_call_operand.hbm [shape: f32[1,32], index: 5, kind: input, shape index: {}]   ;;  %s1675_s6 = inlined_call_operand.hbm [shape: f32[1,32], index: 6, kind: input, shape index: {}]   ;;  %s1676_s7 = inlined_call_operand.hbm [shape: f32[1,32], index: 7, kind: input, shape index: {}]   ;;  %s1677_s8 = inlined_call_operand.hbm [shape: bf16[32,32], index: 8, kind: input, shape index: {}]   ;;  %s1678_s9 = inlined_call_operand.vmem [shape: bf16[32,32], index: 9, kind: input, shape index: {}]   ;;  %s1679_s10 = inlined_call_operand.hbm [shape: f32[1,32], index: 10, kind: input, shape index: {}]   ;;  %s1680_s11 = inlined_call_operand.hbm [shape: bf16[32,32], index: 11, kind: input, shape index: {}]   ;;  %s1681_s12 = inlined_call_operand.hbm [shape: f32[1,32], index: 12, kind: input, shape index: {}]   ;;  %s1682_s13 = inlined_call_operand.hbm [shape: f32[1,32], index: 13, kind: input, shape index: {}]   ;;  %s1683_s14 = inlined_call_operand.hbm [shape: f32[1,32], index: 14, kind: input, shape index: {}]   ;;  %s1684_s15 = inlined_call_operand.hbm [shape: bf16[32,32], index: 15, kind: input, shape index: {}]   ;;  %s1685_s16 = inlined_call_operand.hbm [shape: f32[1,32], index: 16, kind: input, shape index: {}]   ;;  %s1686_s17 = inlined_call_operand.vmem [shape: bf16[32,32], index: 17, kind: input, shape index: {}]   ;;  %s1687_s18 = inlined_call_operand.hbm [shape: f32[1,32], index: 18, kind: input, shape index: {}]   ;;  %s1688_s19 = inlined_call_operand.vmem [shape: f32[16,1], index: 19, kind: input, shape index: {}]   ;;  %s1689_s20 = inlined_call_operand.hbm [shape: f32[16,32], index: 20, kind: output, shape index: {}]  }
   0x1   :  { %1691 = sst [smem:[#allocation39_spill]] %s1669_s0 }
   0x2   :  { %1692 = sst [smem:[#allocation40_spill]] %s1670_s1 }
   0x3   :  { %1693 = sst [smem:[#allocation41_spill]] %s1671_s2 }
   0x4   :  { %1694 = sst [smem:[#allocation42_spill]] %s1672_s3 }
   0x5   :  { %1695 = sst [smem:[#allocation43_spill]] %s1673_s4 }
   0x6   :  { %25 = vsyncpa [#allocation3], 0 }
   0x7   :  { %26 = vsyncpa [#allocation6], 0 }
   0x8   :  { %27 = vsyncpa [#allocation9], 0 }
   0x9   :  { %28 = vsyncpa [#allocation12], 0 }
   0xa   :  { %29 = vsyncpa [#allocation15], 0 }
   0xb   :  { %30 = vsyncpa [#allocation18], 0 }
   0xc   :  { %31 = vsyncpa [#allocation21], 0 }
   0xd   :  { %32 = vsyncpa [#allocation24], 0 }
   0xe   :  { %33 = vsyncpa [#allocation27], 0 }
   0xf   :  { %34 = vsyncpa [#allocation4], 0  ;;  %s1377_s1 = smov [#allocation5]   ;;  %s1378_s23 = smov [#allocation8]  }
  0x10   :  { %s55_s22 = sshll.u32 %s1377_s1, 4  ;;  %s75_s24 = sshll.u32 %s1378_s23, 4  ;;  %s56_s22 = int_to_ptr.vmem [resolvable:$true] %s55_s22  ;;  %s76_s24 = int_to_ptr.vmem [resolvable:$true] %s75_s24 }
  0x11   :  { %s1025_s2 = scalar_lea.vmem %s56_s22, 16  ;;  %s1029_s25 = scalar_lea.vmem %s56_s22, 32 }
  0x12   :  { %p1026_p0 = scmp.ne.s32.totalorder %s56_s22, %s1025_s2  ;;  %p1030_p1 = scmp.lt.s32.totalorder %s56_s22, %s56_s22 }
  0x13   :  { %p1031_p2 = scmp.lt.s32.totalorder %s1029_s25, %s1025_s2 }
  0x15   :  { %p1032_p3 = por %p1031_p2, %p1030_p1 }
  0x17   :  { %p1033_p4 = pnand %p1032_p3, %p1026_p0 }
  0x19   :  { %1036 = shalt.err (!%p1033_p4)
}
  0x1a   :  { %s1696_s27 = sld [smem:[#allocation41_spill]]  ;;  %s1045_s28 = scalar_lea.vmem %s76_s24, 16 }
  0x1b   :  { %p1046_p5 = scmp.ne.s32.totalorder %s76_s24, %s1045_s28  ;;  %s1049_s4 = scalar_lea.vmem %s76_s24, 32 }
  0x1c   :  { %p1050_p6 = scmp.lt.s32.totalorder %s76_s24, %s76_s24  ;;  %p1051_p7 = scmp.lt.s32.totalorder %s1049_s4, %s1045_s28 }
  0x1e   :  { %p1052_p8 = por %p1051_p7, %p1050_p6 }
  0x20   :  { %58 = dma.hbm_to_vmem [thread:$0]  %s1696_s27, 16, %s56_s22, [#allocation6]  }
  0x21   :  { %p1053_p9 = pnand %p1052_p8, %p1046_p5 }
  0x23   :  { %1056 = shalt.err (!%p1053_p9)
}
  0x24   :  { %s1697_s0 = sld [smem:[#allocation43_spill]]  ;;  %s1379_s21 = smov [#allocation11]  }
  0x25   :  { %s95_s1 = sshll.u32 %s1379_s21, 4  ;;  %s1380_s23 = smov [#allocation14]   ;;  %s96_s1 = int_to_ptr.vmem [resolvable:$true] %s95_s1 }
  0x26   :  { %s114_s2 = sshll.u32 %s1380_s23, 4  ;;  %s1065_s25 = scalar_lea.vmem %s96_s1, 16  ;;  %s115_s2 = int_to_ptr.vmem [resolvable:$true] %s114_s2 }
  0x27   :  { %p1066_p10 = scmp.ne.s32.totalorder %s96_s1, %s1065_s25  ;;  %s1069_s22 = scalar_lea.vmem %s96_s1, 32 }
  0x28   :  { %p1070_p11 = scmp.lt.s32.totalorder %s96_s1, %s96_s1  ;;  %p1071_p12 = scmp.lt.s32.totalorder %s1069_s22, %s1065_s25 }
  0x2a   :  { %78 = dma.hbm_to_vmem [thread:$0]  %s1697_s0, 16, %s76_s24, [#allocation9]  }
  0x2b   :  { %p1072_p13 = por %p1071_p12, %p1070_p11 }
  0x2d   :  { %p1073_p0 = pnand %p1072_p13, %p1066_p10 }
  0x2f   :  { %1076 = shalt.err (!%p1073_p0)
}
  0x30   :  { %98 = dma.hbm_to_vmem [thread:$0]  %s1675_s6, 16, %s96_s1, [#allocation12]  }
  0x31   :  { %s1085_s27 = scalar_lea.vmem %s115_s2, 256  ;;  %p1090_p2 = scmp.lt.s32.totalorder %s115_s2, %s115_s2 }
  0x32   :  { %p1086_p1 = scmp.ne.s32.totalorder %s115_s2, %s1085_s27  ;;  %p1091_p3 = scmp.lt.s32.totalorder %s1085_s27, %s1085_s27 }
  0x34   :  { %p1092_p4 = por %p1091_p3, %p1090_p2 }
  0x36   :  { %p1093_p5 = pnand %p1092_p4, %p1086_p1 }
  0x38   :  { %1096 = shalt.err (!%p1093_p5)
}
  0x39   :  { %s1381_s24 = smov 64   ;;  %s1382_s28 = smov 4  }
  0x3a   :  { %120 = dma.hbm_to_vmem [thread:$0]  %s1677_s8, 256, %s115_s2, [#allocation15], %s1381_s24, %s1381_s24, %s1382_s28  }
  0x3b   :  { %s1383_s30 = smov [#allocation17]   ;;  %s1384_s21 = smov [#allocation20]  }
  0x3c   :  { %s138_s0 = sshll.u32 %s1383_s30, 4  ;;  %s161_s6 = sshll.u32 %s1384_s21, 4  ;;  %s139_s0 = int_to_ptr.vmem [resolvable:$true] %s138_s0  ;;  %s162_s6 = int_to_ptr.vmem [resolvable:$true] %s161_s6 }
  0x3d   :  { %s1105_s1 = scalar_lea.vmem %s139_s0, 256  ;;  %p1110_p7 = scmp.lt.s32.totalorder %s139_s0, %s139_s0 }
  0x3e   :  { %p1106_p6 = scmp.ne.s32.totalorder %s139_s0, %s1105_s1  ;;  %p1111_p8 = scmp.lt.s32.totalorder %s1105_s1, %s1105_s1 }
  0x40   :  { %p1112_p9 = por %p1111_p8, %p1110_p7 }
  0x42   :  { %p1113_p10 = pnand %p1112_p9, %p1106_p6 }
  0x44   :  { %1116 = shalt.err (!%p1113_p10)
}
  0x45   :  { %144 = dma.hbm_to_vmem [thread:$0]  %s1680_s11, 256, %s139_s0, [#allocation18], %s1381_s24, %s1381_s24, %s1382_s28  }
  0x46   :  { %s1125_s8 = scalar_lea.vmem %s162_s6, 16  ;;  %s1129_s2 = scalar_lea.vmem %s162_s6, 32 }
  0x47   :  { %p1126_p11 = scmp.ne.s32.totalorder %s162_s6, %s1125_s8  ;;  %p1130_p12 = scmp.lt.s32.totalorder %s162_s6, %s162_s6 }
  0x48   :  { %p1131_p13 = scmp.lt.s32.totalorder %s1129_s2, %s1125_s8 }
  0x4a   :  { %p1132_p0 = por %p1131_p13, %p1130_p12 }
  0x4c   :  { %p1133_p1 = pnand %p1132_p0, %p1126_p11 }
  0x4e   :  { %1136 = shalt.err (!%p1133_p1)
}
  0x4f   :  { %164 = dma.hbm_to_vmem [thread:$0]  %s1682_s13, 16, %s162_s6, [#allocation21]  }
  0x50   :  { %s1385_s26 = smov [#allocation23]   ;;  %s1386_s4 = smov [#allocation2]  }
  0x51   :  { %s180_s27 = sshll.u32 %s1385_s26, 4  ;;  %s42_s29 = sshll.u32 %s1386_s4, 4  ;;  %s181_s27 = int_to_ptr.vmem [resolvable:$true] %s180_s27  ;;  %s43_s29 = int_to_ptr.vmem [resolvable:$true] %s42_s29 }
  0x52   :  { %s1145_s30 = scalar_lea.vmem %s181_s27, 256  ;;  %p1150_p3 = scmp.lt.s32.totalorder %s181_s27, %s181_s27 }
  0x53   :  { %p1146_p2 = scmp.ne.s32.totalorder %s181_s27, %s1145_s30  ;;  %p1151_p4 = scmp.lt.s32.totalorder %s1145_s30, %s1145_s30 }
  0x55   :  { %p1152_p5 = por %p1151_p4, %p1150_p3 }
  0x57   :  { %p1153_p6 = pnand %p1152_p5, %p1146_p2 }
  0x59   :  { %1156 = shalt.err (!%p1153_p6)
}
  0x5a   :  { %186 = dma.hbm_to_vmem [thread:$0]  %s1684_s15, 256, %s181_s27, [#allocation24], %s1381_s24, %s1381_s24, %s1382_s28  }
  0x5b   :  { %s1165_s13 = scalar_lea.vmem %s43_s29, 256  ;;  %p1170_p8 = scmp.lt.s32.totalorder %s43_s29, %s43_s29 }
  0x5c   :  { %p1166_p7 = scmp.ne.s32.totalorder %s43_s29, %s1165_s13  ;;  %p1171_p9 = scmp.lt.s32.totalorder %s1165_s13, %s1165_s13 }
  0x5e   :  { %p1172_p10 = por %p1171_p9, %p1170_p8 }
  0x60   :  { %p1173_p11 = pnand %p1172_p10, %p1166_p7 }
  0x62   :  { %1176 = shalt.err (!%p1173_p11)
}
  0x63   :  { %s1387_s21 = smov 128   ;;  %s1388_s6 = smov 8  }
  0x64   :  { %s1698_s25 = sld [smem:[#allocation40_spill]]  ;;  %s1389_s8 = smov [#allocation7]  }
  0x65   :  { %s65_s2 = sshll.u32 %s1389_s8, 4  ;;  %s1390_s22 = smov [#allocation10]   ;;  %s66_s2 = int_to_ptr.vmem [resolvable:$true] %s65_s2 }
  0x66   :  { %s85_s15 = sshll.u32 %s1390_s22, 4  ;;  %s1185_s24 = scalar_lea.vmem %s66_s2, 16  ;;  %s86_s15 = int_to_ptr.vmem [resolvable:$true] %s85_s15 }
  0x67   :  { %p1186_p12 = scmp.ne.s32.totalorder %s66_s2, %s1185_s24  ;;  %s1189_s28 = scalar_lea.vmem %s66_s2, 32 }
  0x68   :  { %p1190_p13 = scmp.lt.s32.totalorder %s66_s2, %s66_s2  ;;  %p1191_p0 = scmp.lt.s32.totalorder %s1189_s28, %s1185_s24 }
  0x6a   :  { %48 = dma.hbm_to_vmem [thread:$0]  %s1698_s25, 256, %s43_s29, [#allocation3], %s1387_s21, %s1387_s21, %s1388_s6  }
  0x6b   :  { %p1192_p1 = por %p1191_p0, %p1190_p13 }
  0x6d   :  { %p1193_p2 = pnand %p1192_p1, %p1186_p12 }
  0x6f   :  { %1196 = shalt.err (!%p1193_p2)
}
  0x70   :  { %s1699_s27 = sld [smem:[#allocation42_spill]]  ;;  %s1205_s4 = scalar_lea.vmem %s86_s15, 16 }
  0x71   :  { %p1206_p3 = scmp.ne.s32.totalorder %s86_s15, %s1205_s4  ;;  %s1209_s29 = scalar_lea.vmem %s86_s15, 32 }
  0x72   :  { %p1210_p4 = scmp.lt.s32.totalorder %s86_s15, %s86_s15  ;;  %p1211_p5 = scmp.lt.s32.totalorder %s1209_s29, %s1205_s4 }
  0x74   :  { %p1212_p6 = por %p1211_p5, %p1210_p4 }
  0x76   :  { %68 = dma.hbm_to_vmem [thread:$0]  %s1699_s27, 16, %s66_s2, [#allocation6]  }
  0x77   :  { %p1213_p7 = pnand %p1212_p6, %p1206_p3 }
  0x79   :  { %1216 = shalt.err (!%p1213_p7)
}
  0x7a   :  { %88 = dma.hbm_to_vmem [thread:$0]  %s1674_s5, 16, %s86_s15, [#allocation9]  }
  0x7b   :  { %s1391_s0 = smov [#allocation13]   ;;  %s1392_s1 = smov [#allocation16]  }
  0x7c   :  { %s105_s13 = sshll.u32 %s1391_s0, 4  ;;  %s129_s23 = sshll.u32 %s1392_s1, 4  ;;  %s106_s13 = int_to_ptr.vmem [resolvable:$true] %s105_s13  ;;  %s130_s23 = int_to_ptr.vmem [resolvable:$true] %s129_s23 }
  0x7d   :  { %s1225_s25 = scalar_lea.vmem %s106_s13, 16  ;;  %s1229_s8 = scalar_lea.vmem %s106_s13, 32 }
  0x7e   :  { %p1226_p8 = scmp.ne.s32.totalorder %s106_s13, %s1225_s25  ;;  %p1230_p9 = scmp.lt.s32.totalorder %s106_s13, %s106_s13 }
  0x7f   :  { %p1231_p10 = scmp.lt.s32.totalorder %s1229_s8, %s1225_s25 }
  0x81   :  { %p1232_p11 = por %p1231_p10, %p1230_p9 }
  0x83   :  { %p1233_p12 = pnand %p1232_p11, %p1226_p8 }
  0x85   :  { %1236 = shalt.err (!%p1233_p12)
}
  0x86   :  { %108 = dma.hbm_to_vmem [thread:$0]  %s1676_s7, 16, %s106_s13, [#allocation12]  }
  0x87   :  { %s1245_s24 = scalar_lea.vmem %s130_s23, 16  ;;  %s1249_s5 = scalar_lea.vmem %s130_s23, 32 }
  0x88   :  { %p1246_p13 = scmp.ne.s32.totalorder %s130_s23, %s1245_s24  ;;  %p1250_p0 = scmp.lt.s32.totalorder %s130_s23, %s130_s23 }
  0x89   :  { %p1251_p1 = scmp.lt.s32.totalorder %s1249_s5, %s1245_s24 }
  0x8b   :  { %p1252_p2 = por %p1251_p1, %p1250_p0 }
  0x8d   :  { %p1253_p3 = pnand %p1252_p2, %p1246_p13 }
  0x8f   :  { %1256 = shalt.err (!%p1253_p3)
}
  0x90   :  { %132 = dma.hbm_to_vmem [thread:$0]  %s1679_s10, 16, %s130_s23, [#allocation15]  }
  0x91   :  { %s1393_s3 = smov [#allocation19]   ;;  %s1394_s27 = smov [#allocation22]  }
  0x92   :  { %s151_s26 = sshll.u32 %s1393_s3, 4  ;;  %s171_s4 = sshll.u32 %s1394_s27, 4  ;;  %s152_s26 = int_to_ptr.vmem [resolvable:$true] %s151_s26  ;;  %s172_s4 = int_to_ptr.vmem [resolvable:$true] %s171_s4 }
  0x93   :  { %s1265_s29 = scalar_lea.vmem %s152_s26, 16  ;;  %s1269_s7 = scalar_lea.vmem %s152_s26, 32 }
  0x94   :  { %p1266_p4 = scmp.ne.s32.totalorder %s152_s26, %s1265_s29  ;;  %p1270_p5 = scmp.lt.s32.totalorder %s152_s26, %s152_s26 }
  0x95   :  { %p1271_p6 = scmp.lt.s32.totalorder %s1269_s7, %s1265_s29 }
  0x97   :  { %p1272_p7 = por %p1271_p6, %p1270_p5 }
  0x99   :  { %p1273_p8 = pnand %p1272_p7, %p1266_p4 }
  0x9b   :  { %1276 = shalt.err (!%p1273_p8)
}
  0x9c   :  { %154 = dma.hbm_to_vmem [thread:$0]  %s1681_s12, 16, %s152_s26, [#allocation18]  }
  0x9d   :  { %s1285_s0 = scalar_lea.vmem %s172_s4, 16  ;;  %s1289_s10 = scalar_lea.vmem %s172_s4, 32 }
  0x9e   :  { %p1286_p9 = scmp.ne.s32.totalorder %s172_s4, %s1285_s0  ;;  %p1290_p10 = scmp.lt.s32.totalorder %s172_s4, %s172_s4 }
  0x9f   :  { %p1291_p11 = scmp.lt.s32.totalorder %s1289_s10, %s1285_s0 }
  0xa1   :  { %p1292_p12 = por %p1291_p11, %p1290_p10 }
  0xa3   :  { %p1293_p13 = pnand %p1292_p12, %p1286_p9 }
  0xa5   :  { %1296 = shalt.err (!%p1293_p13)
}
  0xa6   :  { %174 = dma.hbm_to_vmem [thread:$0]  %s1683_s14, 16, %s172_s4, [#allocation21]  }
  0xa7   :  { %s1395_s23 = smov [#allocation25]   ;;  %s1396_s8 = smov [#allocation26]  }
  0xa8   :  { %s193_s25 = sshll.u32 %s1395_s23, 4  ;;  %s205_s2 = sshll.u32 %s1396_s8, 4  ;;  %s194_s25 = int_to_ptr.vmem [resolvable:$true] %s193_s25  ;;  %s206_s2 = int_to_ptr.vmem [resolvable:$true] %s205_s2 }
  0xa9   :  { %s1305_s22 = scalar_lea.vmem %s194_s25, 16  ;;  %s1309_s12 = scalar_lea.vmem %s194_s25, 32 }
  0xaa   :  { %p1306_p0 = scmp.ne.s32.totalorder %s194_s25, %s1305_s22  ;;  %p1310_p1 = scmp.lt.s32.totalorder %s194_s25, %s194_s25 }
  0xab   :  { %p1311_p2 = scmp.lt.s32.totalorder %s1309_s12, %s1305_s22 }
  0xad   :  { %p1312_p3 = por %p1311_p2, %p1310_p1 }
  0xaf   :  { %p1313_p4 = pnand %p1312_p3, %p1306_p0 }
  0xb1   :  { %1316 = shalt.err (!%p1313_p4)
}
  0xb2   :  { %196 = dma.hbm_to_vmem [thread:$0]  %s1685_s16, 16, %s194_s25, [#allocation24]  }
  0xb3   :  { %s1325_s15 = scalar_lea.vmem %s206_s2, 16  ;;  %s1329_s14 = scalar_lea.vmem %s206_s2, 32 }
  0xb4   :  { %p1326_p5 = scmp.ne.s32.totalorder %s206_s2, %s1325_s15  ;;  %p1330_p6 = scmp.lt.s32.totalorder %s206_s2, %s206_s2 }
  0xb5   :  { %p1331_p7 = scmp.lt.s32.totalorder %s1329_s14, %s1325_s15 }
  0xb7   :  { %p1332_p8 = por %p1331_p7, %p1330_p6 }
  0xb9   :  { %p1333_p9 = pnand %p1332_p8, %p1326_p5 }
  0xbb   :  { %1336 = shalt.err (!%p1333_p9)
}
  0xbc   :  { %208 = dma.hbm_to_vmem [thread:$0]  %s1687_s18, 16, %s206_s2, [#allocation27]  }
  0xbd   :  { %1357 = dma.done.wait [#allocation3], 256  }
  0xbe   :  { %1358 = vsyncadd [#allocation3], 4294967040 }
  0xbf   :  { %1359 = dma.done.wait [#allocation6], 32  }
  0xc0   :  { %1360 = vsyncadd [#allocation6], 4294967264 }
  0xc1   :  { %1361 = dma.done.wait [#allocation9], 32  }
  0xc2   :  { %1362 = vsyncadd [#allocation9], 4294967264 }
  0xc3   :  { %1363 = dma.done.wait [#allocation12], 32  }
  0xc4   :  { %1364 = vsyncadd [#allocation12], 4294967264 }
  0xc5   :  { %1365 = dma.done.wait [#allocation15], 272  }
  0xc6   :  { %1366 = vsyncadd [#allocation15], 4294967024 }
  0xc7   :  { %1367 = dma.done.wait [#allocation18], 272  }
  0xc8   :  { %1368 = vsyncadd [#allocation18], 4294967024 }
  0xc9   :  { %1369 = dma.done.wait [#allocation21], 32  }
  0xca   :  { %1370 = vsyncadd [#allocation21], 4294967264 }
  0xcb   :  { %1371 = dma.done.wait [#allocation24], 272  }
  0xcc   :  { %1372 = vsyncadd [#allocation24], 4294967024 }
  0xcd   :  { %1373 = dma.done.wait [#allocation27], 16  }
  0xce   :  { %1374 = vsyncadd [#allocation27], 4294967280  ;;  %vm266_vm0 = vcmask 261120   ;;  %s1700_s26 = sld [smem:[#allocation39_spill]]  ;;  %v262_v1 = vld [vmem:[#allocation2] sm:$0xff]  ;;  %v263_v5 = vld [vmem:[#allocation2 + $0x8] sm:$0xff] }
  0xcf   :  { %v309_v4 = vsel %vm266_vm0, %v262_v1, 0.0  ;;  %v312_v7 = vsel %vm266_vm0, %v263_v5, 0.0  ;;  %v865_v41 = vld [vmem:[#allocation5] ss:$0 sm:$0xff]  ;;  %v866_v43 = vld [vmem:[#allocation7] ss:$0 sm:$0xff] }
  0xd0   :  { %310 = vadd.xlane.f32.xlu1 %v309_v4  ;;  %vm1398_vm1 = vmmov 0  }
  0xd4   :  { %v260_v0 = vld [vmem:[%s1700_s26] sm:$0xff]  ;;  %v261_v2 = vld [vmem:[%s1700_s26 + $0x8] sm:$0xff]  ;;  %313 = vadd.xlane.f32.xlu1 %v312_v7 }
  0xd5   :  { %v267_v3 = vsel %vm266_vm0, %v260_v0, 0.0  ;;  %v270_v6 = vsel %vm266_vm0, %v261_v2, 0.0  ;;  %v976_v7 = vld [vmem:[#allocation14 + $0x8] sm:$0xff]  }
  0xd6   :  { %268 = vadd.xlane.f32.xlu0 %v267_v3 }
  0xda   :  { %271 = vadd.xlane.f32.xlu0 %v270_v6  ;;  %v975_v6 = vld [vmem:[%s1678_s9 + $0x8] sm:$0xff]  }
 0x159   :  { %v311_v9 = vpop.xlane.xlu1 %310 }
 0x15a   :  { %v315_v11 = vmul.f32 0.03125, %v311_v9  ;;  %v977_v9 = vld [vmem:[%s1678_s9] sm:$0xff]  }
 0x15c   :  { %v317_v13 = vsub.f32 %v262_v1, %v315_v11 }
 0x15d   :  { %v314_v15 = vpop.xlane.xlu1 %313 }
 0x15e   :  { %v316_v17 = vmul.f32 0.03125, %v314_v15  ;;  %v319_v19 = vmul.f32 %v317_v13, %v317_v13 }
 0x15f   :  { %v269_v8 = vpop.xlane.xlu0 %268 }
 0x160   :  { %v273_v10 = vmul.f32 0.03125, %v269_v8  ;;  %v318_v21 = vsub.f32 %v263_v5, %v316_v17  ;;  %v321_v23 = vsel %vm266_vm0, %v319_v19, 0.0  ;;  %v1397_v8 = vmov 0.0  }
 0x161   :  { %909 = vmatprep.subr.bf16.mxu0 %v1397_v8  ;;  %917 = vmatprep.subr.bf16.mxu1 %v1397_v8 }
 0x162   :  { %v275_v12 = vsub.f32 %v260_v0, %v273_v10  ;;  %v320_v25 = vmul.f32 %v318_v21, %v318_v21  ;;  %910 = vmatpush3.bf16.msra.mxu0 %v975_v6  ;;  %918 = vmatpush3.bf16.msra.mxu1 %v976_v7  ;;  %v978_v10 = vld [vmem:[#allocation14] sm:$0xff]  }
 0x163   :  { %v272_v14 = vpop.xlane.xlu0 %271  ;;  %911 = vmatprep.subr.bf16.mxu0 %v1397_v8  ;;  %919 = vmatprep.subr.bf16.mxu1 %v1397_v8 }
 0x164   :  { %v274_v16 = vmul.f32 0.03125, %v272_v14  ;;  %v277_v18 = vmul.f32 %v275_v12, %v275_v12  ;;  %v324_v27 = vsel %vm266_vm0, %v320_v25, 0.0  ;;  %913 = vmatprep.mubr.msk.bf16.mxu0 %vm1398_vm1, %v1397_v8  ;;  %921 = vmatprep.mubr.msk.bf16.mxu1 %vm1398_vm1, %v1397_v8 }
 0x166   :  { %v276_v20 = vsub.f32 %v261_v2, %v274_v16  ;;  %v279_v22 = vsel %vm266_vm0, %v277_v18, 0.0  ;;  %912 = vmatpush3.bf16.msra.mxu0 %v977_v9  ;;  %920 = vmatpush3.bf16.msra.mxu1 %v978_v10  ;;  %v979_v10 = vld [vmem:[#allocation23 + $0x8] sm:$0xff]  }
 0x167   :  { %280 = vadd.xlane.f32.xlu0 %v279_v22  ;;  %933 = vmatprep.subr.bf16.mxu1 %v1397_v8 }
 0x168   :  { %v278_v24 = vmul.f32 %v276_v20, %v276_v20  ;;  %925 = vmatprep.subr.bf16.mxu0 %v1397_v8 }
 0x16a   :  { %v282_v26 = vsel %vm266_vm0, %v278_v24, 0.0 }
 0x16b   :  { %322 = vadd.xlane.f32.xlu0 %v321_v23  ;;  %283 = vadd.xlane.f32.xlu1 %v282_v26 }
 0x16f   :  { %325 = vadd.xlane.f32.xlu1 %v324_v27 }
 0x1f0   :  { %v281_v28 = vpop.xlane.xlu0 %280 }
 0x1f1   :  { %v285_v29 = vmul.f32 0.03125, %v281_v28 }
 0x1f3   :  { %v287_v30 = vadd.f32 1e-05, %v285_v29 }
 0x1f4   :  { %v284_v31 = vpop.xlane.xlu1 %283  ;;  %v323_v32 = vpop.xlane.xlu0 %322 }
 0x1f5   :  { %985 = vrsqrt.f32 %v287_v30  ;;  %v286_v33 = vmul.f32 0.03125, %v284_v31  ;;  %v327_v34 = vmul.f32 0.03125, %v323_v32 }
 0x1f7   :  { %v288_v35 = vadd.f32 1e-05, %v286_v33  ;;  %v329_v36 = vadd.f32 1e-05, %v327_v34 }
 0x1f8   :  { %v326_v37 = vpop.xlane.xlu1 %325 }
 0x1f9   :  { %987 = vrsqrt.f32 %v288_v35  ;;  %v328_v38 = vmul.f32 0.03125, %v326_v37 }
 0x1fa   :  { %989 = vrsqrt.f32 %v329_v36 }
 0x1fb   :  { %v330_v39 = vadd.f32 1e-05, %v328_v38 }
 0x1fd   :  { %991 = vrsqrt.f32 %v330_v39 }
 0x202   :  { %v986_v40 = vpop.eup %985 }
 0x203   :  { %v291_v42 = vmul.f32 %v986_v40, %v275_v12 }
 0x205   :  { %v299_v44 = vmul.f32 %v865_v41, %v291_v42 }
 0x206   :  { %v988_v45 = vpop.eup %987 }
 0x207   :  { %v990_v46 = vpop.eup %989  ;;  %v1580_v47 = vadd.f32 %v866_v43, %v299_v44  ;;  %v292_v48 = vmul.f32 %v988_v45, %v276_v20 }
 0x208   :  { %v333_v49 = vmul.f32 %v990_v46, %v317_v13 }
 0x209   :  { %v339_v50 = vsel %vm266_vm0, %v1580_v47, 0.0  ;;  %v300_v51 = vmul.f32 %v865_v41, %v292_v48  ;;  %v345_v60 = vmul.f32 %v1580_v47, %v1580_v47  ;;  %v869_v48 = vld [vmem:[#allocation11] ss:$0 sm:$0xff] }
 0x20a   :  { %v992_v52 = vpop.eup %991  ;;  %340 = vadd.xlane.f32.xlu0 %v339_v50  ;;  %v335_v53 = vmul.f32 %v865_v41, %v333_v49  ;;  %v867_v50 = vld [vmem:[#allocation8] ss:$0 sm:$0xff] }
 0x20b   :  { %v334_v54 = vmul.f32 %v992_v52, %v318_v21  ;;  %v1584_v55 = vadd.f32 %v866_v43, %v300_v51  ;;  %v347_v0 = vsel %vm266_vm0, %v345_v60, 0.0 }
 0x20c   :  { %v1586_v56 = vadd.f32 %v866_v43, %v335_v53 }
 0x20d   :  { %v336_v57 = vmul.f32 %v865_v41, %v334_v54  ;;  %v342_v58 = vsel %vm266_vm0, %v1584_v55, 0.0  ;;  %v346_v63 = vmul.f32 %v1584_v55, %v1584_v55 }
 0x20e   :  { %343 = vadd.xlane.f32.xlu1 %v342_v58  ;;  %v353_v59 = vsel %vm266_vm0, %v1586_v56, 0.0  ;;  %v359_v1 = vmul.f32 %v1586_v56, %v1586_v56 }
 0x20f   :  { %v1594_v61 = vadd.f32 %v866_v43, %v336_v57  ;;  %354 = vadd.xlane.f32.xlu0 %v353_v59  ;;  %v350_v2 = vsel %vm266_vm0, %v346_v63, 0.0 }
 0x210   :  { %v361_v4 = vsel %vm266_vm0, %v359_v1, 0.0  ;;  %v868_v1 = vld [vmem:[#allocation10] ss:$0 sm:$0xff] }
 0x211   :  { %v356_v62 = vsel %vm266_vm0, %v1594_v61, 0.0  ;;  %v360_v3 = vmul.f32 %v1594_v61, %v1594_v61 }
 0x212   :  { %357 = vadd.xlane.f32.xlu1 %v356_v62 }
 0x213   :  { %348 = vadd.xlane.f32.xlu0 %v347_v0  ;;  %v364_v5 = vsel %vm266_vm0, %v360_v3, 0.0  ;;  %v870_v0 = vld [vmem:[#allocation13] ss:$0 sm:$0xff] }
 0x216   :  { %351 = vadd.xlane.f32.xlu1 %v350_v2 }
 0x217   :  { %362 = vadd.xlane.f32.xlu0 %v361_v4 }
 0x21a   :  { %365 = vadd.xlane.f32.xlu1 %v364_v5 }
 0x293   :  { %v341_v11 = vpop.xlane.xlu0 %340 }
 0x297   :  { %v344_v12 = vpop.xlane.xlu1 %343 }
 0x298   :  { %v355_v13 = vpop.xlane.xlu0 %354 }
 0x299   :  { %v367_v14 = vadd.f32 %v355_v13, %v341_v11  ;;  %v628_v19 = vmul.f32 0.03125, %v355_v13  ;;  %v882_v11 = vld [vmem:[#allocation20] ss:$0 sm:$0xff] }
 0x29b   :  { %v358_v15 = vpop.xlane.xlu1 %357  ;;  %v369_v18 = vmul.f32 0.015625, %v367_v14  ;;  %v632_v26 = vmul.f32 %v628_v19, %v628_v19  ;;  %v636_v63 = vsub.f32 %v1586_v56, %v628_v19 }
 0x29c   :  { %v349_v16 = vpop.xlane.xlu0 %348  ;;  %v368_v17 = vadd.f32 %v358_v15, %v344_v12  ;;  %v629_v21 = vmul.f32 0.03125, %v358_v15 }
 0x29d   :  { %v375_v27 = vmul.f32 %v369_v18, %v369_v18  ;;  %v383_v43 = vsub.f32 %v1580_v47, %v369_v18  ;;  %v406_v44 = vsub.f32 %v1586_v56, %v369_v18 }
 0x29e   :  { %v370_v25 = vmul.f32 0.015625, %v368_v17  ;;  %v633_v30 = vmul.f32 %v629_v21, %v629_v21  ;;  %v637_v57 = vsub.f32 %v1594_v61, %v629_v21  ;;  %v883_v17 = vld [vmem:[#allocation22] ss:$0 sm:$0xff]  ;;  %v981_v21 = vld [vmem:[#allocation17 + $0x8] sm:$0xff]  }
 0x29f   :  { %v352_v20 = vpop.xlane.xlu1 %351 }
 0x2a0   :  { %v363_v22 = vpop.xlane.xlu0 %362  ;;  %v376_v35 = vmul.f32 %v370_v25, %v370_v25  ;;  %v384_v52 = vsub.f32 %v1584_v55, %v370_v25  ;;  %v407_v53 = vsub.f32 %v1594_v61, %v370_v25  ;;  %v1399_v25 = vmov 0  }
 0x2a1   :  { %v371_v23 = vadd.f32 %v363_v22, %v349_v16  ;;  %v630_v24 = vmul.f32 0.03125, %v363_v22  ;;  %v980_v16 = vld [vmem:[#allocation23] sm:$0xff]   ;;  %v982_v22 = vld [vmem:[#allocation17] sm:$0xff]   ;;  %973 = vset.pattern.permute.xlu0 %v1399_v25  ;;  %974 = vset.pattern.permute.xlu1 %v1399_v25 }
 0x2a3   :  { %v373_v28 = vmul.f32 0.015625, %v371_v23  ;;  %v366_v29 = vpop.xlane.xlu1 %365  ;;  %v634_v34 = vsub.f32 %v630_v24, %v632_v26  ;;  %v816_v23 = vld [vmem:[%s1688_s19] sm:$0xff]  ;;  %v817_v24 = vld [vmem:[%s1688_s19 + $0x8] sm:$0xff] }
 0x2a4   :  { %v372_v31 = vadd.f32 %v366_v29, %v352_v20  ;;  %v631_v32 = vmul.f32 0.03125, %v366_v29  ;;  %822 = vperm.xlu0 %973, %v816_v23   ;;  %827 = vperm.xlu1 %974, %v817_v24   ;;  %v877_v29 = vld [vmem:[#allocation16] ss:$0 sm:$0xff] }
 0x2a5   :  { %v377_v33 = vsub.f32 %v373_v28, %v375_v27  ;;  %v638_v41 = vadd.f32 1e-05, %v634_v34 }
 0x2a6   :  { %v374_v36 = vmul.f32 0.015625, %v372_v31  ;;  %v635_v37 = vsub.f32 %v631_v32, %v633_v30 }
 0x2a7   :  { %v379_v38 = vadd.f32 1e-05, %v377_v33 }
 0x2a8   :  { %v378_v39 = vsub.f32 %v374_v36, %v376_v35  ;;  %v639_v40 = vadd.f32 1e-05, %v635_v37 }
 0x2a9   :  { %993 = vrsqrt.f32 %v379_v38 }
 0x2aa   :  { %v380_v42 = vadd.f32 1e-05, %v378_v39  ;;  %995 = vrsqrt.f32 %v639_v40 }
 0x2ac   :  { %997 = vrsqrt.f32 %v380_v42 }
 0x2ad   :  { %999 = vrsqrt.f32 %v638_v41 }
 0x2b6   :  { %v994_v45 = vpop.eup %993 }
 0x2b7   :  { %v408_v46 = vmul.f32 %v994_v45, %v406_v44  ;;  %v385_v49 = vmul.f32 %v994_v45, %v383_v43  ;;  %v996_v51 = vpop.eup %995  ;;  %v884_v45 = vld [vmem:[#allocation25] ss:$0 sm:$0xff] }
 0x2b8   :  { %v643_v4 = vmul.f32 %v996_v51, %v637_v57  ;;  %v984_v51 = vld [vmem:[%s1686_s17] sm:$0xff]  }
 0x2b9   :  { %v998_v54 = vpop.eup %997  ;;  %v417_v60 = vmul.f32 %v869_v48, %v408_v46  ;;  %v394_v47 = vmul.f32 %v867_v50, %v385_v49  ;;  %v983_v46 = vld [vmem:[%s1686_s17 + $0x8] sm:$0xff]   ;;  %s1400_s17 = smov [#allocation28]  }
 0x2ba   :  { %v1000_v58 = vpop.eup %999  ;;  %v409_v59 = vmul.f32 %v998_v54, %v407_v53  ;;  %v386_v62 = vmul.f32 %v998_v54, %v384_v52  ;;  %v652_v14 = vmul.f32 %v882_v11, %v643_v4  ;;  %s845_s8 = sshll.u32 %s1400_s17, 4  ;;  %s846_s8 = int_to_ptr.vmem [resolvable:$true] %s845_s8 }
 0x2bb   :  { %v642_v5 = vmul.f32 %v1000_v58, %v636_v63  ;;  %v426_v6 = vadd.f32 %v870_v0, %v417_v60  ;;  %v403_v7 = vadd.f32 %v868_v1, %v394_v47  ;;  %s1337_s2 = scalar_lea.vmem %s846_s8, 256  ;;  %p1342_p11 = scmp.lt.s32.totalorder %s846_s8, %s846_s8 }
 0x2bc   :  { %v418_v2 = vmul.f32 %v869_v48, %v409_v59  ;;  %v395_v3 = vmul.f32 %v867_v50, %v386_v62  ;;  %v661_v18 = vadd.f32 %v883_v17, %v652_v14  ;;  %v888_v62 = vld [vmem:[#allocation26] ss:$0 sm:$0xff]  ;;  %p1338_p10 = scmp.ne.s32.totalorder %s846_s8, %s1337_s2  ;;  %p1343_p12 = scmp.lt.s32.totalorder %s1337_s2, %s1337_s2 }
 0x2bd   :  { %v651_v15 = vmul.f32 %v882_v11, %v642_v5 }
 0x2be   :  { %v427_v55 = vadd.f32 %v870_v0, %v418_v2  ;;  %v404_v9 = vadd.f32 %v868_v1, %v395_v3  ;;  %p1344_p13 = por %p1343_p12, %p1342_p11 }
 0x2bf   :  { %v660_v19 = vadd.f32 %v883_v17, %v651_v15  ;;  %v878_v15 = vld [vmem:[#allocation19] ss:$0 sm:$0xff] }
 0x2c0   :  { %v428_v12 = vpack.c.bf16 %v427_v55, %v426_v6  ;;  %v405_v13 = vpack.c.bf16 %v404_v9, %v403_v7  ;;  %p1345_p0 = pnand %p1344_p13, %p1338_p10 }
 0x2c1   :  { %v662_v20 = vpack.c.bf16 %v661_v18, %v660_v19 }
 0x2c2   :  { %914 = vmatmul.mubr.msk.bf16.vlgmr.msra.gmra.mxu0 %vm266_vm0, %v428_v12  ;;  %922 = vmatmul.mubr.msk.bf16.vlgmr.msra.gmra.mxu1 %vm266_vm0, %v405_v13 }
 0x2c3   :  { %934 = vmatpush3.bf16.msra.mxu1 %v979_v10  ;;  %937 = vmatprep.mubr.msk.bf16.mxu1 %vm1398_vm1, %v1397_v8 }
 0x2c4   :  { %935 = vmatprep.subr.bf16.mxu1 %v1397_v8  ;;  %929 = vmatprep.mubr.msk.bf16.mxu0 %vm1398_vm1, %v1397_v8 }
 0x2c5   :  { %926 = vmatpush3.bf16.msra.mxu0 %v981_v21 }
 0x2c6   :  { %927 = vmatprep.subr.bf16.mxu0 %v1397_v8 }
 0x2c7   :  { %936 = vmatpush3.bf16.msra.mxu1 %v980_v16 }
 0x2c9   :  { %928 = vmatpush3.bf16.msra.mxu0 %v982_v22 }
 0x2ca   :  { %938 = vmatmul.mubr.msk.bf16.vlgmr.msra.gmra.mxu1 %vm266_vm0, %v662_v20  ;;  %941 = vmatprep.subr.bf16.mxu0 %v1397_v8 }
 0x31f   :  { %v823_v17 = vpop.permute.xlu0 %822  ;;  %v828_v22 = vpop.permute.xlu1 %827 }
 0x382   :  { %v486_v26 = vpop.f32.mrf.mxu0  ;;  %v542_v27 = vpop.f32.mrf.mxu1 }
 0x383   :  { %v543_v28 = vadd.f32 %v542_v27, %v486_v26 }
 0x384   :  { %v915_v30 = vpop.f32.mrf.mxu0  ;;  %v923_v31 = vpop.f32.mrf.mxu1 }
 0x385   :  { %v556_v32 = vadd.f32 %v877_v29, %v543_v28 }
 0x386   :  { %v489_v33 = vpop.f32.mrf.mxu0  ;;  %v545_v34 = vpop.f32.mrf.mxu1 }
 0x387   :  { %v546_v35 = vadd.f32 %v545_v34, %v489_v33  ;;  %1001 = vtanh.f32 %v556_v32 }
 0x388   :  { %v916_v36 = vpop.f32.mrf.mxu0  ;;  %v924_v37 = vpop.f32.mrf.mxu1 }
 0x389   :  { %v557_v38 = vadd.f32 %v877_v29, %v546_v35 }
 0x38a   :  { %v723_v39 = vpop.f32.mrf.mxu1 }
 0x38b   :  { %1003 = vtanh.f32 %v557_v38  ;;  %v724_v50 = vadd.f32 %v884_v45, %v723_v39 }
 0x38c   :  { %v939_v40 = vpop.f32.mrf.mxu1 }
 0x38d   :  { %v730_v53 = vmax.f32 %v724_v50, 0.0 }
 0x38e   :  { %v726_v41 = vpop.f32.mrf.mxu1 }
 0x38f   :  { %v727_v48 = vadd.f32 %v884_v45, %v726_v41 }
 0x390   :  { %v940_v42 = vpop.f32.mrf.mxu1 }
 0x391   :  { %v731_v52 = vmax.f32 %v727_v48, 0.0 }
 0x393   :  { %v732_v54 = vpack.c.bf16 %v731_v52, %v730_v53 }
 0x394   :  { %v1002_v43 = vpop.eup %1001 }
 0x398   :  { %v1004_v44 = vpop.eup %1003 }
 0x399   :  { %v560_v49 = vpack.c.bf16 %v1004_v44, %v1002_v43 }
 0x39b   :  { %930 = vmatmul.mubr.msk.bf16.vlgmr.msra.gmra.mxu0 %vm266_vm0, %v560_v49 }
 0x39c   :  { %942 = vmatpush3.bf16.msra.mxu0 %v983_v46  ;;  %945 = vmatprep.mubr.msk.bf16.mxu0 %vm1398_vm1, %v1397_v8 }
 0x39d   :  { %943 = vmatprep.subr.bf16.mxu0 %v1397_v8 }
 0x3a0   :  { %944 = vmatpush3.bf16.msra.mxu0 %v984_v51 }
 0x3a3   :  { %946 = vmatmul.mubr.msk.bf16.vlgmr.msra.gmra.mxu0 %vm266_vm0, %v732_v54 }
 0x45b   :  { %v621_v57 = vpop.f32.mrf.mxu0 }
 0x45c   :  { %v622_v16 = vadd.f32 %v878_v15, %v621_v57 }
 0x45d   :  { %v931_v58 = vpop.f32.mrf.mxu0 }
 0x45e   :  { %v832_v19 = vsub.f32 %v622_v16, %v1586_v56 }
 0x45f   :  { %v624_v59 = vpop.f32.mrf.mxu0 }
 0x460   :  { %v625_v20 = vadd.f32 %v878_v15, %v624_v59 }
 0x461   :  { %v932_v60 = vpop.f32.mrf.mxu0 }
 0x462   :  { %v833_v25 = vsub.f32 %v625_v20, %v1594_v61 }
 0x463   :  { %v793_v47 = vpop.f32.mrf.mxu0 }
 0x464   :  { %v794_v63 = vadd.f32 %v888_v62, %v793_v47 }
 0x465   :  { %v947_v0 = vpop.f32.mrf.mxu0 }
 0x466   :  { %v892_v1 = vmul.f32 -1.442695, %v794_v63 }
 0x467   :  { %v796_v2 = vpop.f32.mrf.mxu0 }
 0x468   :  { %1005 = vpow2.f32 %v892_v1  ;;  %v797_v3 = vadd.f32 %v888_v62, %v796_v2 }
 0x469   :  { %v948_v4 = vpop.f32.mrf.mxu0 }
 0x46a   :  { %v893_v5 = vmul.f32 -1.442695, %v797_v3 }
 0x46c   :  { %1007 = vpow2.f32 %v893_v5 }
 0x475   :  { %v1006_v8 = vpop.eup %1005 }
 0x476   :  { %v806_v6 = vadd.f32 1.0, %v1006_v8 }
 0x478   :  { %1009 = vrcp.f32 %v806_v6 }
 0x479   :  { %v1008_v55 = vpop.eup %1007 }
 0x47a   :  { %v807_v7 = vadd.f32 1.0, %v1008_v55 }
 0x47c   :  { %1011 = vrcp.f32 %v807_v7 }
 0x485   :  { %v1010_v9 = vpop.eup %1009 }
 0x486   :  { %v812_v10 = vmul.f32 99.0, %v1010_v9 }
 0x488   :  { %v814_v11 = vadd.f32 1.0, %v812_v10 }
 0x489   :  { %v1012_v12 = vpop.eup %1011 }
 0x48a   :  { %1013 = vrcp.f32 %v814_v11  ;;  %v813_v13 = vmul.f32 99.0, %v1012_v12 }
 0x48c   :  { %v815_v14 = vadd.f32 1.0, %v813_v13 }
 0x48e   :  { %1015 = vrcp.f32 %v815_v14 }
 0x497   :  { %v1014_v18 = vpop.eup %1013 }
 0x498   :  { %v830_v21 = vmul.f32 %v1014_v18, %v823_v17 }
 0x49a   :  { %v834_v23 = vmul.f32 %v832_v19, %v830_v21 }
 0x49b   :  { %v1016_v24 = vpop.eup %1015 }
 0x49c   :  { %v836_v26 = vadd.f32 %v834_v23, %v1586_v56  ;;  %v831_v27 = vmul.f32 %v1016_v24, %v828_v22 }
 0x49e   :  { %838 = vst.msk [vmem:[#allocation28] sm:$0xff] %vm266_vm0, %v836_v26  ;;  %v835_v28 = vmul.f32 %v833_v25, %v831_v27 }
 0x4a0   :  { %v837_v29 = vadd.f32 %v835_v28, %v1594_v61 }
 0x4a2   :  { %839 = vst.msk [vmem:[#allocation28 + $0x8] sm:$0xff] %vm266_vm0, %v837_v29 }
 0x4a3   :  { %1348 = shalt.err (!%p1345_p0)
}
 0x4a4   :  { %851 = dma.vmem_to_hbm [thread:$0]  %s846_s8, 256, %s1689_s20, [#allocation4], %s1387_s21, %s1387_s21, %s1388_s6  }
 0x4a5   :  { %1375 = dma.done.wait [#allocation4], 256  }
 0x4a6   :  { %1376 = vsyncadd [#allocation4], 4294967040 }
 0x4a7   :  { %855 = vsyncpa [#allocation3], 1 }
 0x4a8   :  { %856 = vsyncpa [#allocation6], 1 }
 0x4a9   :  { %857 = vsyncpa [#allocation9], 1 }
 0x4aa   :  { %858 = vsyncpa [#allocation12], 1 }
 0x4ab   :  { %859 = vsyncpa [#allocation15], 1 }
 0x4ac   :  { %860 = vsyncpa [#allocation18], 1 }
 0x4ad   :  { %861 = vsyncpa [#allocation21], 1 }
 0x4ae   :  { %862 = vsyncpa [#allocation24], 1 }
 0x4af   :  { %863 = vsyncpa [#allocation27], 1 }
 0x4b0   :  { %864 = vsyncpa [#allocation4], 1 }

</bundles_post_ra>
